<compile_context>
chip_gen: v7x
topology: tpu7x:2x2x1
jax: 0.10.0
libtpu: 0.0.40
codegen_flags: <defaults>
</compile_context>

<pallas_src>
import jax
import jax.numpy as jnp
from jax import lax
from jax.experimental import pallas as pl
from jax.experimental.pallas import tpu as pltpu

# ----- problem sizes (small, consistent with the module) ---------------------
B = 2                 # batch
S = 8                 # sequence length (must be >= 2: eval spacing is 1/(S-1))
H = 32                # hidden_size
AUG = 10              # augment_dim of odeNet_interval
ODE_STEPS_LOS = 8     # fixed RK4 steps over [0, 1] for odeNet_los
ODE_SUBSTEPS_INT = 2  # RK4 substeps between consecutive eval times

_F32 = jnp.float32


# ----- single fused kernel ----------------------------------------------------
def fused_ode_embeddings_kernel(
        x_ref, x0_ref,
        # odeNet_los: fc1/fc2/fc3 (H->H) + output Linear (H->H)
        lw1_ref, lb1_ref, lw2_ref, lb2_ref, lw3_ref, lb3_ref, llw_ref, llb_ref,
        # odeNet_interval: fc1 split into t-row / x-rows, fc2, fc3, output Linear
        iw1t_ref, iw1x_ref, ib1_ref, iw2_ref, ib2_ref, iw3_ref, ib3_ref,
        ilw_ref, ilb_ref,
        # BertLayerNorm
        gamma_ref, beta_ref,
        # output + scratch
        out_ref, st_ref):
    rows = B * S
    xf = x_ref[...]                                        # [B*S, H]

    # ---------------- odeNet_los: time-independent RK4, t = 0 -> 1 -----------
    w1, w2, w3, lw = lw1_ref[...], lw2_ref[...], lw3_ref[...], llw_ref[...]
    # hoist bias broadcasts out of the integration loop (JAX does not CSE them)
    b1 = jnp.broadcast_to(lb1_ref[...], (rows, H))
    b2 = jnp.broadcast_to(lb2_ref[...], (rows, H))
    b3 = jnp.broadcast_to(lb3_ref[...], (rows, H))
    lb = jnp.broadcast_to(llb_ref[...], (rows, H))
    dt = 1.0 / ODE_STEPS_LOS

    def f_los(y):
        h1 = jnp.maximum(jnp.dot(y, w1, preferred_element_type=_F32) + b1, 0.0)
        h2 = jnp.maximum(jnp.dot(h1, w2, preferred_element_type=_F32) + b2, 0.0)
        return jnp.dot(h2, w3, preferred_element_type=_F32) + b3

    def los_step(_, y):
        k1 = f_los(y)
        k2 = f_los(y + (0.5 * dt) * k1)
        k3 = f_los(y + (0.5 * dt) * k2)
        k4 = f_los(y + dt * k3)
        return y + (dt / 6.0) * (k1 + 2.0 * k2 + 2.0 * k3 + k4)

    y_los = lax.fori_loop(0, ODE_STEPS_LOS, los_step, xf)
    los = jnp.dot(y_los, lw, preferred_element_type=_F32) + lb       # [B*S, H]

    # ---------------- odeNet_interval: time-dependent, augmented -------------
    w1x, iw2, iw3, ilw = iw1x_ref[...], iw2_ref[...], iw3_ref[...], ilw_ref[...]
    w1t = jnp.broadcast_to(iw1t_ref[...], (B, H))
    ib1 = jnp.broadcast_to(ib1_ref[...], (B, H))
    ib2 = jnp.broadcast_to(ib2_ref[...], (B, H))
    ib3 = jnp.broadcast_to(ib3_ref[...], (B, H + AUG))
    ilb = jnp.broadcast_to(ilb_ref[...], (rows, H))

    def f_int(t, ya):
        # fc1(cat([t, y])) == y @ W_x + (t * W_t + b1)   (no in-kernel concat)
        h1 = jnp.maximum(
            jnp.dot(ya, w1x, preferred_element_type=_F32) + (t * w1t + ib1), 0.0)
        h2 = jnp.maximum(jnp.dot(h1, iw2, preferred_element_type=_F32) + ib2, 0.0)
        return jnp.dot(h2, iw3, preferred_element_type=_F32) + ib3

    # augmented initial state y0 = [x[:, 0, :], zeros(AUG)] built in VMEM scratch
    st_ref[0] = jnp.zeros((B, H + AUG), _F32)
    st_ref[0, :, 0:H] = x0_ref[...]
    y0 = st_ref[0]                                          # [B, H+AUG]

    dt_eval = 1.0 / (S - 1)                                 # linspace(0,1,S) spacing
    dti = dt_eval / ODE_SUBSTEPS_INT

    def seg_step(s, ya):
        # integrate from t_{s-1} to t_s, then record the state for eval time s
        t0 = (s - 1).astype(_F32) * dt_eval
        for k in range(ODE_SUBSTEPS_INT):                   # innermost: static / unrolled
            t = t0 + k * dti
            k1 = f_int(t, ya)
            k2 = f_int(t + 0.5 * dti, ya + (0.5 * dti) * k1)
            k3 = f_int(t + 0.5 * dti, ya + (0.5 * dti) * k2)
            k4 = f_int(t + dti, ya + dti * k3)
            ya = ya + (dti / 6.0) * (k1 + 2.0 * k2 + 2.0 * k3 + k4)
        st_ref[s] = ya                                      # dynamic first-axis store
        return ya

    lax.fori_loop(1, S, seg_step, y0)

    # One batched final Linear over all S states; states are assembled batch-major
    # so rows line up with x_flat / los -> no [S,B,H]->[B,S,H] transpose anywhere.
    states_bm = jnp.concatenate([st_ref[:, b, :] for b in range(B)], axis=0)  # [B*S, H+AUG]
    interval = jnp.dot(states_bm, ilw, preferred_element_type=_F32) + ilb     # [B*S, H]

    # ---------- residual add + dropout (eval: identity) + BertLayerNorm ------
    e = xf + interval + los
    mean = jnp.mean(e, axis=-1, keepdims=True)
    var = jnp.mean(e * e, axis=-1, keepdims=True) - mean * mean   # one-pass variance
    nrm = (e - mean) * lax.rsqrt(var + 1e-12)
    gamma = jnp.broadcast_to(gamma_ref[...], (rows, H))
    beta = jnp.broadcast_to(beta_ref[...], (rows, H))
    # TODO(synk): output kept as a single [B*S, H] store (lane-masked at H=32); a
    #             [4,128] lane-dense repack was skipped since the lane-changing
    #             in-kernel reshape is not guaranteed to lower and output is 2 KiB.
    out_ref[...] = nrm * gamma + beta


# ----- glue -------------------------------------------------------------------
def ode_embeddings(x, params):
    """x: [B, S, H] float32 -> embeddings [B, S, H] float32."""
    b, s, h = x.shape
    x_flat = x.reshape(b * s, h)          # free row-major reshape
    x0 = x[:, 0, :]                       # [B, H] initial state for the interval ODE

    args = (x_flat, x0, *params["los"], *params["interval"],
            params["gamma"], params["beta"])
    out_flat = pl.pallas_call(
        fused_ode_embeddings_kernel,
        out_shape=jax.ShapeDtypeStruct((b * s, h), _F32),
        in_specs=[pl.BlockSpec(memory_space=pltpu.MemorySpace.VMEM)] * len(args),
        out_specs=pl.BlockSpec(memory_space=pltpu.MemorySpace.VMEM),
        scratch_shapes=[pltpu.VMEM((s, b, h + AUG), _F32)],   # interval ODE states
    )(*args)
    return out_flat.reshape(b, s, h)


def init_params(key):
    ks = jax.random.split(key, 9)

    def w(k, shape):
        return (0.02 * jax.random.normal(k, shape)).astype(_F32)

    zeros = lambda shape: jnp.zeros(shape, _F32)
    # odeNet_los: fc1/fc2/fc3 (H->H) + Linear (H->H)
    los = (w(ks[0], (H, H)), zeros((1, H)),
           w(ks[1], (H, H)), zeros((1, H)),
           w(ks[2], (H, H)), zeros((1, H)),
           w(ks[3], (H, H)), zeros((1, H)))
    # odeNet_interval: fc1 (1+H+AUG -> H) split into t-row / x-rows,
    #                  fc2 (H->H), fc3 (H -> H+AUG), Linear (H+AUG -> H)
    interval = (w(ks[4], (1, H)),            # W1_t
                w(ks[5], (H + AUG, H)),      # W1_x
                zeros((1, H)),               # b1
                w(ks[6], (H, H)), zeros((1, H)),
                w(ks[7], (H, H + AUG)), zeros((1, H + AUG)),
                w(ks[8], (H + AUG, H)), zeros((1, H)))
    return {
        "los": los,
        "interval": interval,
        "gamma": jnp.ones((1, H), _F32),
        "beta": jnp.zeros((1, H), _F32),
    }


if __name__ == "__main__":
    key = jax.random.PRNGKey(0)
    k_x, k_p = jax.random.split(key)
    x = jax.random.normal(k_x, (B, S, H), dtype=_F32)
    params = init_params(k_p)

    out = jax.jit(ode_embeddings)(x, params)
    out = jax.block_until_ready(out)
    assert out.shape == (B, S, H) and out.dtype == jnp.float32
    assert bool(jnp.all(jnp.isfinite(out)))
    print("KERNEL_OK")
</pallas_src>

<mosaic_0001>
module attributes {stable_mosaic.version = 11 : i64} {
  func.func @fused_ode_embeddings_kernel(%arg0: memref<16x32xf32, #tpu.memory_space<vmem>>, %arg1: memref<2x32xf32, #tpu.memory_space<vmem>>, %arg2: memref<32x32xf32, #tpu.memory_space<vmem>>, %arg3: memref<1x32xf32, #tpu.memory_space<vmem>>, %arg4: memref<32x32xf32, #tpu.memory_space<vmem>>, %arg5: memref<1x32xf32, #tpu.memory_space<vmem>>, %arg6: memref<32x32xf32, #tpu.memory_space<vmem>>, %arg7: memref<1x32xf32, #tpu.memory_space<vmem>>, %arg8: memref<32x32xf32, #tpu.memory_space<vmem>>, %arg9: memref<1x32xf32, #tpu.memory_space<vmem>>, %arg10: memref<1x32xf32, #tpu.memory_space<vmem>>, %arg11: memref<42x32xf32, #tpu.memory_space<vmem>>, %arg12: memref<1x32xf32, #tpu.memory_space<vmem>>, %arg13: memref<32x32xf32, #tpu.memory_space<vmem>>, %arg14: memref<1x32xf32, #tpu.memory_space<vmem>>, %arg15: memref<32x42xf32, #tpu.memory_space<vmem>>, %arg16: memref<1x42xf32, #tpu.memory_space<vmem>>, %arg17: memref<42x32xf32, #tpu.memory_space<vmem>>, %arg18: memref<1x32xf32, #tpu.memory_space<vmem>>, %arg19: memref<1x32xf32, #tpu.memory_space<vmem>>, %arg20: memref<1x32xf32, #tpu.memory_space<vmem>>, %arg21: memref<16x32xf32, #tpu.memory_space<vmem>>, %arg22: memref<8x2x42xf32, #tpu.memory_space<vmem>>) attributes {dimension_semantics = [], scalar_prefetch = 0 : i64, scratch_operands = 1 : i64, tpu.core_type = #tpu.core_type<tc>} {
    %c0 = arith.constant 0 : index
    %c0_0 = arith.constant 0 : index
    %0 = vector.load %arg0[%c0, %c0_0] : memref<16x32xf32, #tpu.memory_space<vmem>>, vector<16x32xf32>
    %c0_1 = arith.constant 0 : index
    %c0_2 = arith.constant 0 : index
    %1 = vector.load %arg2[%c0_1, %c0_2] : memref<32x32xf32, #tpu.memory_space<vmem>>, vector<32x32xf32>
    %c0_3 = arith.constant 0 : index
    %c0_4 = arith.constant 0 : index
    %2 = vector.load %arg4[%c0_3, %c0_4] : memref<32x32xf32, #tpu.memory_space<vmem>>, vector<32x32xf32>
    %c0_5 = arith.constant 0 : index
    %c0_6 = arith.constant 0 : index
    %3 = vector.load %arg6[%c0_5, %c0_6] : memref<32x32xf32, #tpu.memory_space<vmem>>, vector<32x32xf32>
    %c0_7 = arith.constant 0 : index
    %c0_8 = arith.constant 0 : index
    %4 = vector.load %arg8[%c0_7, %c0_8] : memref<32x32xf32, #tpu.memory_space<vmem>>, vector<32x32xf32>
    %c0_9 = arith.constant 0 : index
    %c0_10 = arith.constant 0 : index
    %5 = vector.load %arg3[%c0_9, %c0_10] : memref<1x32xf32, #tpu.memory_space<vmem>>, vector<1x32xf32>
    %6 = vector.shape_cast %5 : vector<1x32xf32> to vector<1x32xf32>
    %7 = vector.broadcast %6 : vector<1x32xf32> to vector<16x32xf32>
    %c0_11 = arith.constant 0 : index
    %c0_12 = arith.constant 0 : index
    %8 = vector.load %arg5[%c0_11, %c0_12] : memref<1x32xf32, #tpu.memory_space<vmem>>, vector<1x32xf32>
    %9 = vector.shape_cast %8 : vector<1x32xf32> to vector<1x32xf32>
    %10 = vector.broadcast %9 : vector<1x32xf32> to vector<16x32xf32>
    %c0_13 = arith.constant 0 : index
    %c0_14 = arith.constant 0 : index
    %11 = vector.load %arg7[%c0_13, %c0_14] : memref<1x32xf32, #tpu.memory_space<vmem>>, vector<1x32xf32>
    %12 = vector.shape_cast %11 : vector<1x32xf32> to vector<1x32xf32>
    %13 = vector.broadcast %12 : vector<1x32xf32> to vector<16x32xf32>
    %c0_15 = arith.constant 0 : index
    %c0_16 = arith.constant 0 : index
    %14 = vector.load %arg9[%c0_15, %c0_16] : memref<1x32xf32, #tpu.memory_space<vmem>>, vector<1x32xf32>
    %15 = vector.shape_cast %14 : vector<1x32xf32> to vector<1x32xf32>
    %16 = vector.broadcast %15 : vector<1x32xf32> to vector<16x32xf32>
    %c0_i32 = arith.constant 0 : i32
    %c8_i32 = arith.constant 8 : i32
    %17 = arith.addi %c0_i32, %c8_i32 : i32
    %c1_i32 = arith.constant 1 : i32
    %18 = scf.for %arg23 = %c0_i32 to %17 step %c1_i32 iter_args(%arg24 = %0) -> (vector<16x32xf32>)  : i32 {
      %cst_67 = arith.constant dense<0.000000e+00> : vector<16x32xf32>
      %88 = tpu.matmul %arg24, %1, %cst_67 {dimension_numbers = #tpu.dot_dimension_numbers<[1], [0], [0], [1], [0, 0, 1, 1], [], []>} : vector<16x32xf32>, vector<32x32xf32>, vector<16x32xf32> -> vector<16x32xf32>
      %89 = arith.addf %88, %7 : vector<16x32xf32>
      %cst_68 = arith.constant 0.000000e+00 : f32
      %90 = vector.broadcast %cst_68 : f32 to vector<16x32xf32>
      %91 = arith.maximumf %89, %90 : vector<16x32xf32>
      %cst_69 = arith.constant dense<0.000000e+00> : vector<16x32xf32>
      %92 = tpu.matmul %91, %2, %cst_69 {dimension_numbers = #tpu.dot_dimension_numbers<[1], [0], [0], [1], [0, 0, 1, 1], [], []>} : vector<16x32xf32>, vector<32x32xf32>, vector<16x32xf32> -> vector<16x32xf32>
      %93 = arith.addf %92, %10 : vector<16x32xf32>
      %cst_70 = arith.constant 0.000000e+00 : f32
      %94 = vector.broadcast %cst_70 : f32 to vector<16x32xf32>
      %95 = arith.maximumf %93, %94 : vector<16x32xf32>
      %cst_71 = arith.constant dense<0.000000e+00> : vector<16x32xf32>
      %96 = tpu.matmul %95, %3, %cst_71 {dimension_numbers = #tpu.dot_dimension_numbers<[1], [0], [0], [1], [0, 0, 1, 1], [], []>} : vector<16x32xf32>, vector<32x32xf32>, vector<16x32xf32> -> vector<16x32xf32>
      %97 = arith.addf %96, %13 : vector<16x32xf32>
      %cst_72 = arith.constant 6.250000e-02 : f32
      %98 = vector.broadcast %cst_72 : f32 to vector<16x32xf32>
      %99 = arith.mulf %98, %97 : vector<16x32xf32>
      %100 = arith.addf %arg24, %99 : vector<16x32xf32>
      %cst_73 = arith.constant dense<0.000000e+00> : vector<16x32xf32>
      %101 = tpu.matmul %100, %1, %cst_73 {dimension_numbers = #tpu.dot_dimension_numbers<[1], [0], [0], [1], [0, 0, 1, 1], [], []>} : vector<16x32xf32>, vector<32x32xf32>, vector<16x32xf32> -> vector<16x32xf32>
      %102 = arith.addf %101, %7 : vector<16x32xf32>
      %cst_74 = arith.constant 0.000000e+00 : f32
      %103 = vector.broadcast %cst_74 : f32 to vector<16x32xf32>
      %104 = arith.maximumf %102, %103 : vector<16x32xf32>
      %cst_75 = arith.constant dense<0.000000e+00> : vector<16x32xf32>
      %105 = tpu.matmul %104, %2, %cst_75 {dimension_numbers = #tpu.dot_dimension_numbers<[1], [0], [0], [1], [0, 0, 1, 1], [], []>} : vector<16x32xf32>, vector<32x32xf32>, vector<16x32xf32> -> vector<16x32xf32>
      %106 = arith.addf %105, %10 : vector<16x32xf32>
      %cst_76 = arith.constant 0.000000e+00 : f32
      %107 = vector.broadcast %cst_76 : f32 to vector<16x32xf32>
      %108 = arith.maximumf %106, %107 : vector<16x32xf32>
      %cst_77 = arith.constant dense<0.000000e+00> : vector<16x32xf32>
      %109 = tpu.matmul %108, %3, %cst_77 {dimension_numbers = #tpu.dot_dimension_numbers<[1], [0], [0], [1], [0, 0, 1, 1], [], []>} : vector<16x32xf32>, vector<32x32xf32>, vector<16x32xf32> -> vector<16x32xf32>
      %110 = arith.addf %109, %13 : vector<16x32xf32>
      %cst_78 = arith.constant 6.250000e-02 : f32
      %111 = vector.broadcast %cst_78 : f32 to vector<16x32xf32>
      %112 = arith.mulf %111, %110 : vector<16x32xf32>
      %113 = arith.addf %arg24, %112 : vector<16x32xf32>
      %cst_79 = arith.constant dense<0.000000e+00> : vector<16x32xf32>
      %114 = tpu.matmul %113, %1, %cst_79 {dimension_numbers = #tpu.dot_dimension_numbers<[1], [0], [0], [1], [0, 0, 1, 1], [], []>} : vector<16x32xf32>, vector<32x32xf32>, vector<16x32xf32> -> vector<16x32xf32>
      %115 = arith.addf %114, %7 : vector<16x32xf32>
      %cst_80 = arith.constant 0.000000e+00 : f32
      %116 = vector.broadcast %cst_80 : f32 to vector<16x32xf32>
      %117 = arith.maximumf %115, %116 : vector<16x32xf32>
      %cst_81 = arith.constant dense<0.000000e+00> : vector<16x32xf32>
      %118 = tpu.matmul %117, %2, %cst_81 {dimension_numbers = #tpu.dot_dimension_numbers<[1], [0], [0], [1], [0, 0, 1, 1], [], []>} : vector<16x32xf32>, vector<32x32xf32>, vector<16x32xf32> -> vector<16x32xf32>
      %119 = arith.addf %118, %10 : vector<16x32xf32>
      %cst_82 = arith.constant 0.000000e+00 : f32
      %120 = vector.broadcast %cst_82 : f32 to vector<16x32xf32>
      %121 = arith.maximumf %119, %120 : vector<16x32xf32>
      %cst_83 = arith.constant dense<0.000000e+00> : vector<16x32xf32>
      %122 = tpu.matmul %121, %3, %cst_83 {dimension_numbers = #tpu.dot_dimension_numbers<[1], [0], [0], [1], [0, 0, 1, 1], [], []>} : vector<16x32xf32>, vector<32x32xf32>, vector<16x32xf32> -> vector<16x32xf32>
      %123 = arith.addf %122, %13 : vector<16x32xf32>
      %cst_84 = arith.constant 1.250000e-01 : f32
      %124 = vector.broadcast %cst_84 : f32 to vector<16x32xf32>
      %125 = arith.mulf %124, %123 : vector<16x32xf32>
      %126 = arith.addf %arg24, %125 : vector<16x32xf32>
      %cst_85 = arith.constant dense<0.000000e+00> : vector<16x32xf32>
      %127 = tpu.matmul %126, %1, %cst_85 {dimension_numbers = #tpu.dot_dimension_numbers<[1], [0], [0], [1], [0, 0, 1, 1], [], []>} : vector<16x32xf32>, vector<32x32xf32>, vector<16x32xf32> -> vector<16x32xf32>
      %128 = arith.addf %127, %7 : vector<16x32xf32>
      %cst_86 = arith.constant 0.000000e+00 : f32
      %129 = vector.broadcast %cst_86 : f32 to vector<16x32xf32>
      %130 = arith.maximumf %128, %129 : vector<16x32xf32>
      %cst_87 = arith.constant dense<0.000000e+00> : vector<16x32xf32>
      %131 = tpu.matmul %130, %2, %cst_87 {dimension_numbers = #tpu.dot_dimension_numbers<[1], [0], [0], [1], [0, 0, 1, 1], [], []>} : vector<16x32xf32>, vector<32x32xf32>, vector<16x32xf32> -> vector<16x32xf32>
      %132 = arith.addf %131, %10 : vector<16x32xf32>
      %cst_88 = arith.constant 0.000000e+00 : f32
      %133 = vector.broadcast %cst_88 : f32 to vector<16x32xf32>
      %134 = arith.maximumf %132, %133 : vector<16x32xf32>
      %cst_89 = arith.constant dense<0.000000e+00> : vector<16x32xf32>
      %135 = tpu.matmul %134, %3, %cst_89 {dimension_numbers = #tpu.dot_dimension_numbers<[1], [0], [0], [1], [0, 0, 1, 1], [], []>} : vector<16x32xf32>, vector<32x32xf32>, vector<16x32xf32> -> vector<16x32xf32>
      %136 = arith.addf %135, %13 : vector<16x32xf32>
      %cst_90 = arith.constant 2.000000e+00 : f32
      %137 = vector.broadcast %cst_90 : f32 to vector<16x32xf32>
      %138 = arith.mulf %137, %110 : vector<16x32xf32>
      %139 = arith.addf %97, %138 : vector<16x32xf32>
      %cst_91 = arith.constant 2.000000e+00 : f32
      %140 = vector.broadcast %cst_91 : f32 to vector<16x32xf32>
      %141 = arith.mulf %140, %123 : vector<16x32xf32>
      %142 = arith.addf %139, %141 : vector<16x32xf32>
      %143 = arith.addf %142, %136 : vector<16x32xf32>
      %cst_92 = arith.constant 0.020833334 : f32
      %144 = vector.broadcast %cst_92 : f32 to vector<16x32xf32>
      %145 = arith.mulf %144, %143 : vector<16x32xf32>
      %146 = arith.addf %arg24, %145 : vector<16x32xf32>
      scf.yield %146 : vector<16x32xf32>
    }
    %cst = arith.constant dense<0.000000e+00> : vector<16x32xf32>
    %19 = tpu.matmul %18, %4, %cst {dimension_numbers = #tpu.dot_dimension_numbers<[1], [0], [0], [1], [0, 0, 1, 1], [], []>} : vector<16x32xf32>, vector<32x32xf32>, vector<16x32xf32> -> vector<16x32xf32>
    %20 = arith.addf %19, %16 : vector<16x32xf32>
    %c0_17 = arith.constant 0 : index
    %c0_18 = arith.constant 0 : index
    %21 = vector.load %arg11[%c0_17, %c0_18] : memref<42x32xf32, #tpu.memory_space<vmem>>, vector<42x32xf32>
    %c0_19 = arith.constant 0 : index
    %c0_20 = arith.constant 0 : index
    %22 = vector.load %arg13[%c0_19, %c0_20] : memref<32x32xf32, #tpu.memory_space<vmem>>, vector<32x32xf32>
    %c0_21 = arith.constant 0 : index
    %c0_22 = arith.constant 0 : index
    %23 = vector.load %arg15[%c0_21, %c0_22] : memref<32x42xf32, #tpu.memory_space<vmem>>, vector<32x42xf32>
    %c0_23 = arith.constant 0 : index
    %c0_24 = arith.constant 0 : index
    %24 = vector.load %arg17[%c0_23, %c0_24] : memref<42x32xf32, #tpu.memory_space<vmem>>, vector<42x32xf32>
    %c0_25 = arith.constant 0 : index
    %c0_26 = arith.constant 0 : index
    %25 = vector.load %arg10[%c0_25, %c0_26] : memref<1x32xf32, #tpu.memory_space<vmem>>, vector<1x32xf32>
    %26 = vector.shape_cast %25 : vector<1x32xf32> to vector<1x32xf32>
    %27 = vector.broadcast %26 : vector<1x32xf32> to vector<2x32xf32>
    %c0_27 = arith.constant 0 : index
    %c0_28 = arith.constant 0 : index
    %28 = vector.load %arg12[%c0_27, %c0_28] : memref<1x32xf32, #tpu.memory_space<vmem>>, vector<1x32xf32>
    %29 = vector.shape_cast %28 : vector<1x32xf32> to vector<1x32xf32>
    %30 = vector.broadcast %29 : vector<1x32xf32> to vector<2x32xf32>
    %c0_29 = arith.constant 0 : index
    %c0_30 = arith.constant 0 : index
    %31 = vector.load %arg14[%c0_29, %c0_30] : memref<1x32xf32, #tpu.memory_space<vmem>>, vector<1x32xf32>
    %32 = vector.shape_cast %31 : vector<1x32xf32> to vector<1x32xf32>
    %33 = vector.broadcast %32 : vector<1x32xf32> to vector<2x32xf32>
    %c0_31 = arith.constant 0 : index
    %c0_32 = arith.constant 0 : index
    %34 = vector.load %arg16[%c0_31, %c0_32] : memref<1x42xf32, #tpu.memory_space<vmem>>, vector<1x42xf32>
    %35 = vector.shape_cast %34 : vector<1x42xf32> to vector<1x42xf32>
    %36 = vector.broadcast %35 : vector<1x42xf32> to vector<2x42xf32>
    %c0_33 = arith.constant 0 : index
    %c0_34 = arith.constant 0 : index
    %37 = vector.load %arg18[%c0_33, %c0_34] : memref<1x32xf32, #tpu.memory_space<vmem>>, vector<1x32xf32>
    %38 = vector.shape_cast %37 : vector<1x32xf32> to vector<1x32xf32>
    %39 = vector.broadcast %38 : vector<1x32xf32> to vector<16x32xf32>
    %cst_35 = arith.constant 0.000000e+00 : f32
    %40 = vector.broadcast %cst_35 : f32 to vector<2x42xf32>
    %c0_36 = arith.constant 0 : index
    %c0_37 = arith.constant 0 : index
    %c0_38 = arith.constant 0 : index
    %41 = vector.load %arg22[%c0_36, %c0_37, %c0_38] : memref<8x2x42xf32, #tpu.memory_space<vmem>>, vector<1x2x42xf32>
    %42 = vector.shape_cast %41 : vector<1x2x42xf32> to vector<2x42xf32>
    %43 = vector.shape_cast %40 : vector<2x42xf32> to vector<1x2x42xf32>
    tpu.vector_store %arg22[%c0_36, %c0_37, %c0_38], %43 {strides = array<i32>} : memref<8x2x42xf32, #tpu.memory_space<vmem>>, vector<1x2x42xf32>,
    %c0_39 = arith.constant 0 : index
    %c0_40 = arith.constant 0 : index
    %44 = vector.load %arg1[%c0_39, %c0_40] : memref<2x32xf32, #tpu.memory_space<vmem>>, vector<2x32xf32>
    %c0_41 = arith.constant 0 : index
    %c0_42 = arith.constant 0 : index
    %c0_43 = arith.constant 0 : index
    %45 = vector.load %arg22[%c0_41, %c0_42, %c0_43] : memref<8x2x42xf32, #tpu.memory_space<vmem>>, vector<1x2x32xf32>
    %46 = vector.shape_cast %45 : vector<1x2x32xf32> to vector<2x32xf32>
    %47 = vector.shape_cast %44 : vector<2x32xf32> to vector<1x2x32xf32>
    tpu.vector_store %arg22[%c0_41, %c0_42, %c0_43], %47 {strides = array<i32>} : memref<8x2x42xf32, #tpu.memory_space<vmem>>, vector<1x2x32xf32>,
    %c0_44 = arith.constant 0 : index
    %c0_45 = arith.constant 0 : index
    %c0_46 = arith.constant 0 : index
    %48 = vector.load %arg22[%c0_44, %c0_45, %c0_46] : memref<8x2x42xf32, #tpu.memory_space<vmem>>, vector<1x2x42xf32>
    %49 = vector.shape_cast %48 : vector<1x2x42xf32> to vector<2x42xf32>
    %c1_i32_47 = arith.constant 1 : i32
    %c7_i32 = arith.constant 7 : i32
    %50 = arith.addi %c1_i32_47, %c7_i32 : i32
    %c1_i32_48 = arith.constant 1 : i32
    %51 = scf.for %arg23 = %c1_i32_47 to %50 step %c1_i32_48 iter_args(%arg24 = %49) -> (vector<2x42xf32>)  : i32 {
      %c1_i32_67 = arith.constant 1 : i32
      %88 = arith.subi %arg23, %c1_i32_67 : i32
      %89 = arith.sitofp %88 : i32 to f32
      %cst_68 = arith.constant 0.142857149 : f32
      %90 = arith.mulf %89, %cst_68 : f32
      %cst_69 = arith.constant 0.000000e+00 : f32
      %91 = arith.addf %90, %cst_69 : f32
      %cst_70 = arith.constant dense<0.000000e+00> : vector<2x32xf32>
      %92 = tpu.matmul %arg24, %21, %cst_70 {dimension_numbers = #tpu.dot_dimension_numbers<[1], [0], [0], [1], [0, 0, 1, 1], [], []>} : vector<2x42xf32>, vector<42x32xf32>, vector<2x32xf32> -> vector<2x32xf32>
      %93 = vector.broadcast %91 : f32 to vector<2x32xf32>
      %94 = arith.mulf %93, %27 : vector<2x32xf32>
      %95 = arith.addf %94, %30 : vector<2x32xf32>
      %96 = arith.addf %92, %95 : vector<2x32xf32>
      %cst_71 = arith.constant 0.000000e+00 : f32
      %97 = vector.broadcast %cst_71 : f32 to vector<2x32xf32>
      %98 = arith.maximumf %96, %97 : vector<2x32xf32>
      %cst_72 = arith.constant dense<0.000000e+00> : vector<2x32xf32>
      %99 = tpu.matmul %98, %22, %cst_72 {dimension_numbers = #tpu.dot_dimension_numbers<[1], [0], [0], [1], [0, 0, 1, 1], [], []>} : vector<2x32xf32>, vector<32x32xf32>, vector<2x32xf32> -> vector<2x32xf32>
      %100 = arith.addf %99, %33 : vector<2x32xf32>
      %cst_73 = arith.constant 0.000000e+00 : f32
      %101 = vector.broadcast %cst_73 : f32 to vector<2x32xf32>
      %102 = arith.maximumf %100, %101 : vector<2x32xf32>
      %cst_74 = arith.constant dense<0.000000e+00> : vector<2x42xf32>
      %103 = tpu.matmul %102, %23, %cst_74 {dimension_numbers = #tpu.dot_dimension_numbers<[1], [0], [0], [1], [0, 0, 1, 1], [], []>} : vector<2x32xf32>, vector<32x42xf32>, vector<2x42xf32> -> vector<2x42xf32>
      %104 = arith.addf %103, %36 : vector<2x42xf32>
      %cst_75 = arith.constant 0.0357142873 : f32
      %105 = arith.addf %91, %cst_75 : f32
      %cst_76 = arith.constant 0.0357142873 : f32
      %106 = vector.broadcast %cst_76 : f32 to vector<2x42xf32>
      %107 = arith.mulf %106, %104 : vector<2x42xf32>
      %108 = arith.addf %arg24, %107 : vector<2x42xf32>
      %cst_77 = arith.constant dense<0.000000e+00> : vector<2x32xf32>
      %109 = tpu.matmul %108, %21, %cst_77 {dimension_numbers = #tpu.dot_dimension_numbers<[1], [0], [0], [1], [0, 0, 1, 1], [], []>} : vector<2x42xf32>, vector<42x32xf32>, vector<2x32xf32> -> vector<2x32xf32>
      %110 = vector.broadcast %105 : f32 to vector<2x32xf32>
      %111 = arith.mulf %110, %27 : vector<2x32xf32>
      %112 = arith.addf %111, %30 : vector<2x32xf32>
      %113 = arith.addf %109, %112 : vector<2x32xf32>
      %cst_78 = arith.constant 0.000000e+00 : f32
      %114 = vector.broadcast %cst_78 : f32 to vector<2x32xf32>
      %115 = arith.maximumf %113, %114 : vector<2x32xf32>
      %cst_79 = arith.constant dense<0.000000e+00> : vector<2x32xf32>
      %116 = tpu.matmul %115, %22, %cst_79 {dimension_numbers = #tpu.dot_dimension_numbers<[1], [0], [0], [1], [0, 0, 1, 1], [], []>} : vector<2x32xf32>, vector<32x32xf32>, vector<2x32xf32> -> vector<2x32xf32>
      %117 = arith.addf %116, %33 : vector<2x32xf32>
      %cst_80 = arith.constant 0.000000e+00 : f32
      %118 = vector.broadcast %cst_80 : f32 to vector<2x32xf32>
      %119 = arith.maximumf %117, %118 : vector<2x32xf32>
      %cst_81 = arith.constant dense<0.000000e+00> : vector<2x42xf32>
      %120 = tpu.matmul %119, %23, %cst_81 {dimension_numbers = #tpu.dot_dimension_numbers<[1], [0], [0], [1], [0, 0, 1, 1], [], []>} : vector<2x32xf32>, vector<32x42xf32>, vector<2x42xf32> -> vector<2x42xf32>
      %121 = arith.addf %120, %36 : vector<2x42xf32>
      %cst_82 = arith.constant 0.0357142873 : f32
      %122 = arith.addf %91, %cst_82 : f32
      %cst_83 = arith.constant 0.0357142873 : f32
      %123 = vector.broadcast %cst_83 : f32 to vector<2x42xf32>
      %124 = arith.mulf %123, %121 : vector<2x42xf32>
      %125 = arith.addf %arg24, %124 : vector<2x42xf32>
      %cst_84 = arith.constant dense<0.000000e+00> : vector<2x32xf32>
      %126 = tpu.matmul %125, %21, %cst_84 {dimension_numbers = #tpu.dot_dimension_numbers<[1], [0], [0], [1], [0, 0, 1, 1], [], []>} : vector<2x42xf32>, vector<42x32xf32>, vector<2x32xf32> -> vector<2x32xf32>
      %127 = vector.broadcast %122 : f32 to vector<2x32xf32>
      %128 = arith.mulf %127, %27 : vector<2x32xf32>
      %129 = arith.addf %128, %30 : vector<2x32xf32>
      %130 = arith.addf %126, %129 : vector<2x32xf32>
      %cst_85 = arith.constant 0.000000e+00 : f32
      %131 = vector.broadcast %cst_85 : f32 to vector<2x32xf32>
      %132 = arith.maximumf %130, %131 : vector<2x32xf32>
      %cst_86 = arith.constant dense<0.000000e+00> : vector<2x32xf32>
      %133 = tpu.matmul %132, %22, %cst_86 {dimension_numbers = #tpu.dot_dimension_numbers<[1], [0], [0], [1], [0, 0, 1, 1], [], []>} : vector<2x32xf32>, vector<32x32xf32>, vector<2x32xf32> -> vector<2x32xf32>
      %134 = arith.addf %133, %33 : vector<2x32xf32>
      %cst_87 = arith.constant 0.000000e+00 : f32
      %135 = vector.broadcast %cst_87 : f32 to vector<2x32xf32>
      %136 = arith.maximumf %134, %135 : vector<2x32xf32>
      %cst_88 = arith.constant dense<0.000000e+00> : vector<2x42xf32>
      %137 = tpu.matmul %136, %23, %cst_88 {dimension_numbers = #tpu.dot_dimension_numbers<[1], [0], [0], [1], [0, 0, 1, 1], [], []>} : vector<2x32xf32>, vector<32x42xf32>, vector<2x42xf32> -> vector<2x42xf32>
      %138 = arith.addf %137, %36 : vector<2x42xf32>
      %cst_89 = arith.constant 0.0714285746 : f32
      %139 = arith.addf %91, %cst_89 : f32
      %cst_90 = arith.constant 0.0714285746 : f32
      %140 = vector.broadcast %cst_90 : f32 to vector<2x42xf32>
      %141 = arith.mulf %140, %138 : vector<2x42xf32>
      %142 = arith.addf %arg24, %141 : vector<2x42xf32>
      %cst_91 = arith.constant dense<0.000000e+00> : vector<2x32xf32>
      %143 = tpu.matmul %142, %21, %cst_91 {dimension_numbers = #tpu.dot_dimension_numbers<[1], [0], [0], [1], [0, 0, 1, 1], [], []>} : vector<2x42xf32>, vector<42x32xf32>, vector<2x32xf32> -> vector<2x32xf32>
      %144 = vector.broadcast %139 : f32 to vector<2x32xf32>
      %145 = arith.mulf %144, %27 : vector<2x32xf32>
      %146 = arith.addf %145, %30 : vector<2x32xf32>
      %147 = arith.addf %143, %146 : vector<2x32xf32>
      %cst_92 = arith.constant 0.000000e+00 : f32
      %148 = vector.broadcast %cst_92 : f32 to vector<2x32xf32>
      %149 = arith.maximumf %147, %148 : vector<2x32xf32>
      %cst_93 = arith.constant dense<0.000000e+00> : vector<2x32xf32>
      %150 = tpu.matmul %149, %22, %cst_93 {dimension_numbers = #tpu.dot_dimension_numbers<[1], [0], [0], [1], [0, 0, 1, 1], [], []>} : vector<2x32xf32>, vector<32x32xf32>, vector<2x32xf32> -> vector<2x32xf32>
      %151 = arith.addf %150, %33 : vector<2x32xf32>
      %cst_94 = arith.constant 0.000000e+00 : f32
      %152 = vector.broadcast %cst_94 : f32 to vector<2x32xf32>
      %153 = arith.maximumf %151, %152 : vector<2x32xf32>
      %cst_95 = arith.constant dense<0.000000e+00> : vector<2x42xf32>
      %154 = tpu.matmul %153, %23, %cst_95 {dimension_numbers = #tpu.dot_dimension_numbers<[1], [0], [0], [1], [0, 0, 1, 1], [], []>} : vector<2x32xf32>, vector<32x42xf32>, vector<2x42xf32> -> vector<2x42xf32>
      %155 = arith.addf %154, %36 : vector<2x42xf32>
      %cst_96 = arith.constant 2.000000e+00 : f32
      %156 = vector.broadcast %cst_96 : f32 to vector<2x42xf32>
      %157 = arith.mulf %156, %121 : vector<2x42xf32>
      %158 = arith.addf %104, %157 : vector<2x42xf32>
      %cst_97 = arith.constant 2.000000e+00 : f32
      %159 = vector.broadcast %cst_97 : f32 to vector<2x42xf32>
      %160 = arith.mulf %159, %138 : vector<2x42xf32>
      %161 = arith.addf %158, %160 : vector<2x42xf32>
      %162 = arith.addf %161, %155 : vector<2x42xf32>
      %cst_98 = arith.constant 0.0119047621 : f32
      %163 = vector.broadcast %cst_98 : f32 to vector<2x42xf32>
      %164 = arith.mulf %163, %162 : vector<2x42xf32>
      %165 = arith.addf %arg24, %164 : vector<2x42xf32>
      %cst_99 = arith.constant 0.0714285746 : f32
      %166 = arith.addf %90, %cst_99 : f32
      %cst_100 = arith.constant dense<0.000000e+00> : vector<2x32xf32>
      %167 = tpu.matmul %165, %21, %cst_100 {dimension_numbers = #tpu.dot_dimension_numbers<[1], [0], [0], [1], [0, 0, 1, 1], [], []>} : vector<2x42xf32>, vector<42x32xf32>, vector<2x32xf32> -> vector<2x32xf32>
      %168 = vector.broadcast %166 : f32 to vector<2x32xf32>
      %169 = arith.mulf %168, %27 : vector<2x32xf32>
      %170 = arith.addf %169, %30 : vector<2x32xf32>
      %171 = arith.addf %167, %170 : vector<2x32xf32>
      %cst_101 = arith.constant 0.000000e+00 : f32
      %172 = vector.broadcast %cst_101 : f32 to vector<2x32xf32>
      %173 = arith.maximumf %171, %172 : vector<2x32xf32>
      %cst_102 = arith.constant dense<0.000000e+00> : vector<2x32xf32>
      %174 = tpu.matmul %173, %22, %cst_102 {dimension_numbers = #tpu.dot_dimension_numbers<[1], [0], [0], [1], [0, 0, 1, 1], [], []>} : vector<2x32xf32>, vector<32x32xf32>, vector<2x32xf32> -> vector<2x32xf32>
      %175 = arith.addf %174, %33 : vector<2x32xf32>
      %cst_103 = arith.constant 0.000000e+00 : f32
      %176 = vector.broadcast %cst_103 : f32 to vector<2x32xf32>
      %177 = arith.maximumf %175, %176 : vector<2x32xf32>
      %cst_104 = arith.constant dense<0.000000e+00> : vector<2x42xf32>
      %178 = tpu.matmul %177, %23, %cst_104 {dimension_numbers = #tpu.dot_dimension_numbers<[1], [0], [0], [1], [0, 0, 1, 1], [], []>} : vector<2x32xf32>, vector<32x42xf32>, vector<2x42xf32> -> vector<2x42xf32>
      %179 = arith.addf %178, %36 : vector<2x42xf32>
      %cst_105 = arith.constant 0.0357142873 : f32
      %180 = arith.addf %166, %cst_105 : f32
      %cst_106 = arith.constant 0.0357142873 : f32
      %181 = vector.broadcast %cst_106 : f32 to vector<2x42xf32>
      %182 = arith.mulf %181, %179 : vector<2x42xf32>
      %183 = arith.addf %165, %182 : vector<2x42xf32>
      %cst_107 = arith.constant dense<0.000000e+00> : vector<2x32xf32>
      %184 = tpu.matmul %183, %21, %cst_107 {dimension_numbers = #tpu.dot_dimension_numbers<[1], [0], [0], [1], [0, 0, 1, 1], [], []>} : vector<2x42xf32>, vector<42x32xf32>, vector<2x32xf32> -> vector<2x32xf32>
      %185 = vector.broadcast %180 : f32 to vector<2x32xf32>
      %186 = arith.mulf %185, %27 : vector<2x32xf32>
      %187 = arith.addf %186, %30 : vector<2x32xf32>
      %188 = arith.addf %184, %187 : vector<2x32xf32>
      %cst_108 = arith.constant 0.000000e+00 : f32
      %189 = vector.broadcast %cst_108 : f32 to vector<2x32xf32>
      %190 = arith.maximumf %188, %189 : vector<2x32xf32>
      %cst_109 = arith.constant dense<0.000000e+00> : vector<2x32xf32>
      %191 = tpu.matmul %190, %22, %cst_109 {dimension_numbers = #tpu.dot_dimension_numbers<[1], [0], [0], [1], [0, 0, 1, 1], [], []>} : vector<2x32xf32>, vector<32x32xf32>, vector<2x32xf32> -> vector<2x32xf32>
      %192 = arith.addf %191, %33 : vector<2x32xf32>
      %cst_110 = arith.constant 0.000000e+00 : f32
      %193 = vector.broadcast %cst_110 : f32 to vector<2x32xf32>
      %194 = arith.maximumf %192, %193 : vector<2x32xf32>
      %cst_111 = arith.constant dense<0.000000e+00> : vector<2x42xf32>
      %195 = tpu.matmul %194, %23, %cst_111 {dimension_numbers = #tpu.dot_dimension_numbers<[1], [0], [0], [1], [0, 0, 1, 1], [], []>} : vector<2x32xf32>, vector<32x42xf32>, vector<2x42xf32> -> vector<2x42xf32>
      %196 = arith.addf %195, %36 : vector<2x42xf32>
      %cst_112 = arith.constant 0.0357142873 : f32
      %197 = arith.addf %166, %cst_112 : f32
      %cst_113 = arith.constant 0.0357142873 : f32
      %198 = vector.broadcast %cst_113 : f32 to vector<2x42xf32>
      %199 = arith.mulf %198, %196 : vector<2x42xf32>
      %200 = arith.addf %165, %199 : vector<2x42xf32>
      %cst_114 = arith.constant dense<0.000000e+00> : vector<2x32xf32>
      %201 = tpu.matmul %200, %21, %cst_114 {dimension_numbers = #tpu.dot_dimension_numbers<[1], [0], [0], [1], [0, 0, 1, 1], [], []>} : vector<2x42xf32>, vector<42x32xf32>, vector<2x32xf32> -> vector<2x32xf32>
      %202 = vector.broadcast %197 : f32 to vector<2x32xf32>
      %203 = arith.mulf %202, %27 : vector<2x32xf32>
      %204 = arith.addf %203, %30 : vector<2x32xf32>
      %205 = arith.addf %201, %204 : vector<2x32xf32>
      %cst_115 = arith.constant 0.000000e+00 : f32
      %206 = vector.broadcast %cst_115 : f32 to vector<2x32xf32>
      %207 = arith.maximumf %205, %206 : vector<2x32xf32>
      %cst_116 = arith.constant dense<0.000000e+00> : vector<2x32xf32>
      %208 = tpu.matmul %207, %22, %cst_116 {dimension_numbers = #tpu.dot_dimension_numbers<[1], [0], [0], [1], [0, 0, 1, 1], [], []>} : vector<2x32xf32>, vector<32x32xf32>, vector<2x32xf32> -> vector<2x32xf32>
      %209 = arith.addf %208, %33 : vector<2x32xf32>
      %cst_117 = arith.constant 0.000000e+00 : f32
      %210 = vector.broadcast %cst_117 : f32 to vector<2x32xf32>
      %211 = arith.maximumf %209, %210 : vector<2x32xf32>
      %cst_118 = arith.constant dense<0.000000e+00> : vector<2x42xf32>
      %212 = tpu.matmul %211, %23, %cst_118 {dimension_numbers = #tpu.dot_dimension_numbers<[1], [0], [0], [1], [0, 0, 1, 1], [], []>} : vector<2x32xf32>, vector<32x42xf32>, vector<2x42xf32> -> vector<2x42xf32>
      %213 = arith.addf %212, %36 : vector<2x42xf32>
      %cst_119 = arith.constant 0.0714285746 : f32
      %214 = arith.addf %166, %cst_119 : f32
      %cst_120 = arith.constant 0.0714285746 : f32
      %215 = vector.broadcast %cst_120 : f32 to vector<2x42xf32>
      %216 = arith.mulf %215, %213 : vector<2x42xf32>
      %217 = arith.addf %165, %216 : vector<2x42xf32>
      %cst_121 = arith.constant dense<0.000000e+00> : vector<2x32xf32>
      %218 = tpu.matmul %217, %21, %cst_121 {dimension_numbers = #tpu.dot_dimension_numbers<[1], [0], [0], [1], [0, 0, 1, 1], [], []>} : vector<2x42xf32>, vector<42x32xf32>, vector<2x32xf32> -> vector<2x32xf32>
      %219 = vector.broadcast %214 : f32 to vector<2x32xf32>
      %220 = arith.mulf %219, %27 : vector<2x32xf32>
      %221 = arith.addf %220, %30 : vector<2x32xf32>
      %222 = arith.addf %218, %221 : vector<2x32xf32>
      %cst_122 = arith.constant 0.000000e+00 : f32
      %223 = vector.broadcast %cst_122 : f32 to vector<2x32xf32>
      %224 = arith.maximumf %222, %223 : vector<2x32xf32>
      %cst_123 = arith.constant dense<0.000000e+00> : vector<2x32xf32>
      %225 = tpu.matmul %224, %22, %cst_123 {dimension_numbers = #tpu.dot_dimension_numbers<[1], [0], [0], [1], [0, 0, 1, 1], [], []>} : vector<2x32xf32>, vector<32x32xf32>, vector<2x32xf32> -> vector<2x32xf32>
      %226 = arith.addf %225, %33 : vector<2x32xf32>
      %cst_124 = arith.constant 0.000000e+00 : f32
      %227 = vector.broadcast %cst_124 : f32 to vector<2x32xf32>
      %228 = arith.maximumf %226, %227 : vector<2x32xf32>
      %cst_125 = arith.constant dense<0.000000e+00> : vector<2x42xf32>
      %229 = tpu.matmul %228, %23, %cst_125 {dimension_numbers = #tpu.dot_dimension_numbers<[1], [0], [0], [1], [0, 0, 1, 1], [], []>} : vector<2x32xf32>, vector<32x42xf32>, vector<2x42xf32> -> vector<2x42xf32>
      %230 = arith.addf %229, %36 : vector<2x42xf32>
      %cst_126 = arith.constant 2.000000e+00 : f32
      %231 = vector.broadcast %cst_126 : f32 to vector<2x42xf32>
      %232 = arith.mulf %231, %196 : vector<2x42xf32>
      %233 = arith.addf %179, %232 : vector<2x42xf32>
      %cst_127 = arith.constant 2.000000e+00 : f32
      %234 = vector.broadcast %cst_127 : f32 to vector<2x42xf32>
      %235 = arith.mulf %234, %213 : vector<2x42xf32>
      %236 = arith.addf %233, %235 : vector<2x42xf32>
      %237 = arith.addf %236, %230 : vector<2x42xf32>
      %cst_128 = arith.constant 0.0119047621 : f32
      %238 = vector.broadcast %cst_128 : f32 to vector<2x42xf32>
      %239 = arith.mulf %238, %237 : vector<2x42xf32>
      %240 = arith.addf %165, %239 : vector<2x42xf32>
      %241 = arith.index_cast %arg23 : i32 to index
      %c0_129 = arith.constant 0 : index
      %c0_130 = arith.constant 0 : index
      %242 = vector.load %arg22[%241, %c0_129, %c0_130] : memref<8x2x42xf32, #tpu.memory_space<vmem>>, vector<1x2x42xf32>
      %243 = vector.shape_cast %242 : vector<1x2x42xf32> to vector<2x42xf32>
      %244 = vector.shape_cast %240 : vector<2x42xf32> to vector<1x2x42xf32>
      tpu.vector_store %arg22[%241, %c0_129, %c0_130], %244 {strides = array<i32>} : memref<8x2x42xf32, #tpu.memory_space<vmem>>, vector<1x2x42xf32>,
      scf.yield %240 : vector<2x42xf32>
    }
    %c7_i32_49 = arith.constant 7 : i32
    %c0_50 = arith.constant 0 : index
    %c0_51 = arith.constant 0 : index
    %c0_52 = arith.constant 0 : index
    %52 = vector.load %arg22[%c0_50, %c0_51, %c0_52] : memref<8x2x42xf32, #tpu.memory_space<vmem>>, vector<8x1x42xf32>
    %53 = vector.shape_cast %52 : vector<8x1x42xf32> to vector<8x42xf32>
    %c0_53 = arith.constant 0 : index
    %c1 = arith.constant 1 : index
    %c0_54 = arith.constant 0 : index
    %54 = vector.load %arg22[%c0_53, %c1, %c0_54] : memref<8x2x42xf32, #tpu.memory_space<vmem>>, vector<8x1x42xf32>
    %55 = vector.shape_cast %54 : vector<8x1x42xf32> to vector<8x42xf32>
    %56 = tpu.concatenate %53, %55 in 0 : vector<8x42xf32>, vector<8x42xf32> -> vector<16x42xf32>
    %cst_55 = arith.constant dense<0.000000e+00> : vector<16x32xf32>
    %57 = tpu.matmul %56, %24, %cst_55 {dimension_numbers = #tpu.dot_dimension_numbers<[1], [0], [0], [1], [0, 0, 1, 1], [], []>} : vector<16x42xf32>, vector<42x32xf32>, vector<16x32xf32> -> vector<16x32xf32>
    %58 = arith.addf %57, %39 : vector<16x32xf32>
    %59 = arith.addf %0, %58 : vector<16x32xf32>
    %60 = arith.addf %59, %20 : vector<16x32xf32>
    %cst_56 = arith.constant dense<0.000000e+00> : vector<16xf32>
    %61 = vector.multi_reduction <add>, %60, %cst_56 [1] : vector<16x32xf32> to vector<16xf32>
    %62 = vector.shape_cast %61 : vector<16xf32> to vector<16x1xf32>
    %cst_57 = arith.constant 3.200000e+01 : f32
    %63 = vector.broadcast %cst_57 : f32 to vector<16x1xf32>
    %64 = arith.divf %62, %63 : vector<16x1xf32>
    %65 = arith.mulf %60, %60 : vector<16x32xf32>
    %cst_58 = arith.constant dense<0.000000e+00> : vector<16xf32>
    %66 = vector.multi_reduction <add>, %65, %cst_58 [1] : vector<16x32xf32> to vector<16xf32>
    %67 = vector.shape_cast %66 : vector<16xf32> to vector<16x1xf32>
    %cst_59 = arith.constant 3.200000e+01 : f32
    %68 = vector.broadcast %cst_59 : f32 to vector<16x1xf32>
    %69 = arith.divf %67, %68 : vector<16x1xf32>
    %70 = arith.mulf %64, %64 : vector<16x1xf32>
    %71 = arith.subf %69, %70 : vector<16x1xf32>
    %72 = vector.broadcast %64 : vector<16x1xf32> to vector<16x32xf32>
    %73 = arith.subf %60, %72 : vector<16x32xf32>
    %cst_60 = arith.constant 9.99999996E-13 : f32
    %74 = vector.broadcast %cst_60 : f32 to vector<16x1xf32>
    %75 = arith.addf %71, %74 : vector<16x1xf32>
    %76 = math.rsqrt %75 : vector<16x1xf32>
    %77 = vector.broadcast %76 : vector<16x1xf32> to vector<16x32xf32>
    %78 = arith.mulf %73, %77 : vector<16x32xf32>
    %c0_61 = arith.constant 0 : index
    %c0_62 = arith.constant 0 : index
    %79 = vector.load %arg19[%c0_61, %c0_62] : memref<1x32xf32, #tpu.memory_space<vmem>>, vector<1x32xf32>
    %80 = vector.shape_cast %79 : vector<1x32xf32> to vector<1x32xf32>
    %81 = vector.broadcast %80 : vector<1x32xf32> to vector<16x32xf32>
    %c0_63 = arith.constant 0 : index
    %c0_64 = arith.constant 0 : index
    %82 = vector.load %arg20[%c0_63, %c0_64] : memref<1x32xf32, #tpu.memory_space<vmem>>, vector<1x32xf32>
    %83 = vector.shape_cast %82 : vector<1x32xf32> to vector<1x32xf32>
    %84 = vector.broadcast %83 : vector<1x32xf32> to vector<16x32xf32>
    %85 = arith.mulf %78, %81 : vector<16x32xf32>
    %86 = arith.addf %85, %84 : vector<16x32xf32>
    %c0_65 = arith.constant 0 : index
    %c0_66 = arith.constant 0 : index
    %87 = vector.load %arg21[%c0_65, %c0_66] : memref<16x32xf32, #tpu.memory_space<vmem>>, vector<16x32xf32>
    tpu.vector_store %arg21[%c0_65, %c0_66], %86 {strides = array<i32>} : memref<16x32xf32, #tpu.memory_space<vmem>>, vector<16x32xf32>,
    return
  }
}

</mosaic_0001>

<bundles_post_ra>
// kernel: ode_embeddings.1
= control target key start
LH: loop header
LB: loop body
LE: loop exit
PB: predicated region body
PF: predicated region fallthrough
CT: control target
= control target key end

     0   :  { %s5784_s0 = inlined_call_operand.vmem [shape: f32[16,32], index: 0, kind: input, shape index: {}]   ;;  %s5785_s1 = inlined_call_operand.vmem [shape: f32[2,32], index: 1, kind: input, shape index: {}]   ;;  %s5786_s2 = inlined_call_operand.vmem [shape: f32[32,32], index: 2, kind: input, shape index: {}]   ;;  %s5787_s3 = inlined_call_operand.vmem [shape: f32[1,32], index: 3, kind: input, shape index: {}]   ;;  %s5788_s4 = inlined_call_operand.vmem [shape: f32[32,32], index: 4, kind: input, shape index: {}]   ;;  %s5789_s5 = inlined_call_operand.vmem [shape: f32[1,32], index: 5, kind: input, shape index: {}]   ;;  %s5790_s6 = inlined_call_operand.vmem [shape: f32[32,32], index: 6, kind: input, shape index: {}]   ;;  %s5791_s7 = inlined_call_operand.vmem [shape: f32[1,32], index: 7, kind: input, shape index: {}]   ;;  %s5792_s8 = inlined_call_operand.vmem [shape: f32[32,32], index: 8, kind: input, shape index: {}]   ;;  %s5793_s9 = inlined_call_operand.vmem [shape: f32[1,32], index: 9, kind: input, shape index: {}]   ;;  %s5794_s10 = inlined_call_operand.hbm [shape: f32[1,32], index: 10, kind: input, shape index: {}]   ;;  %s5795_s11 = inlined_call_operand.vmem [shape: f32[42,32], index: 11, kind: input, shape index: {}]   ;;  %s5796_s12 = inlined_call_operand.hbm [shape: f32[1,32], index: 12, kind: input, shape index: {}]   ;;  %s5797_s13 = inlined_call_operand.hbm [shape: f32[32,32], index: 13, kind: input, shape index: {}]   ;;  %s5798_s14 = inlined_call_operand.hbm [shape: f32[1,32], index: 14, kind: input, shape index: {}]   ;;  %s5799_s15 = inlined_call_operand.vmem [shape: f32[32,42], index: 15, kind: input, shape index: {}]   ;;  %s5800_s16 = inlined_call_operand.hbm [shape: f32[1,42], index: 16, kind: input, shape index: {}]   ;;  %s5801_s17 = inlined_call_operand.vmem [shape: f32[42,32], index: 17, kind: input, shape index: {}]   ;;  %s5802_s18 = inlined_call_operand.hbm [shape: f32[1,32], index: 18, kind: input, shape index: {}]   ;;  %s5803_s19 = inlined_call_operand.hbm [shape: f32[1,32], index: 19, kind: input, shape index: {}]   ;;  %s5804_s20 = inlined_call_operand.hbm [shape: f32[1,32], index: 20, kind: input, shape index: {}]   ;;  %s5805_s21 = inlined_call_operand.hbm [shape: f32[16,32], index: 21, kind: output, shape index: {}]  }
   0x1   :  { %5809 = sst [smem:[#allocation24_spill]] %s5784_s0 }
   0x2   :  { %5810 = sst [smem:[#allocation25_spill]] %s5785_s1 }
   0x3   :  { %5811 = sst [smem:[#allocation26_spill]] %s5786_s2 }
   0x4   :  { %5812 = sst [smem:[#allocation27_spill]] %s5787_s3 }
   0x5   :  { %5813 = sst [smem:[#allocation28_spill]] %s5788_s4 }
   0x6   :  { %5814 = sst [smem:[#allocation29_spill]] %s5789_s5 }
   0x7   :  { %26 = vsyncpa [#allocation4], 0 }
   0x8   :  { %27 = vsyncpa [#allocation7], 0 }
   0x9   :  { %28 = vsyncpa [#allocation10], 0 }
   0xa   :  { %29 = vsyncpa [#allocation13], 0 }
   0xb   :  { %30 = vsyncpa [#allocation16], 0 }
   0xc   :  { %31 = vsyncpa [#allocation5], 0  ;;  %s4814_s2 = smov [#allocation6]   ;;  %s4815_s26 = smov [#allocation9]  }
   0xd   :  { %s70_s25 = sshll.u32 %s4814_s2, 4  ;;  %s92_s27 = sshll.u32 %s4815_s26, 4  ;;  %s71_s25 = int_to_ptr.vmem [resolvable:$true] %s70_s25  ;;  %s93_s27 = int_to_ptr.vmem [resolvable:$true] %s92_s27 }
   0xe   :  { %s4564_s29 = scalar_lea.hbm %s5796_s12, 16 }
   0xf   :  { %p4565_p0 = scmp.ne.s32.totalorder %s5796_s12, %s4564_s29  ;;  %p4568_p1 = scmp.lt.u32.totalorder %s4564_s29, %s5796_s12 }
  0x11   :  { %p4570_p2 = pnand %p4568_p1, %p4565_p0 }
  0x13   :  { %4573 = shalt.err (!%p4570_p2)
}
  0x14   :  { %s4574_s22 = scalar_lea.vmem %s71_s25, 16  ;;  %s4578_s23 = scalar_lea.vmem %s71_s25, 32 }
  0x15   :  { %p4575_p3 = scmp.ne.s32.totalorder %s71_s25, %s4574_s22  ;;  %p4579_p4 = scmp.lt.s32.totalorder %s71_s25, %s71_s25 }
  0x16   :  { %p4580_p5 = scmp.lt.s32.totalorder %s4578_s23, %s4574_s22 }
  0x18   :  { %p4581_p6 = por %p4580_p5, %p4579_p4 }
  0x1a   :  { %p4582_p7 = pnand %p4581_p6, %p4575_p3 }
  0x1c   :  { %4585 = shalt.err (!%p4582_p7)
}
  0x1d   :  { %73 = dma.hbm_to_vmem [thread:$0]  %s5796_s12, 16, %s71_s25, [#allocation7]  }
  0x1e   :  { %s4586_s3 = scalar_lea.hbm %s5798_s14, 16 }
  0x1f   :  { %p4587_p8 = scmp.ne.s32.totalorder %s5798_s14, %s4586_s3  ;;  %p4590_p9 = scmp.lt.u32.totalorder %s4586_s3, %s5798_s14 }
  0x21   :  { %p4592_p10 = pnand %p4590_p9, %p4587_p8 }
  0x23   :  { %4595 = shalt.err (!%p4592_p10)
}
  0x24   :  { %s4596_s30 = scalar_lea.vmem %s93_s27, 16  ;;  %s4600_s5 = scalar_lea.vmem %s93_s27, 32 }
  0x25   :  { %p4597_p11 = scmp.ne.s32.totalorder %s93_s27, %s4596_s30  ;;  %p4601_p12 = scmp.lt.s32.totalorder %s93_s27, %s93_s27 }
  0x26   :  { %p4602_p13 = scmp.lt.s32.totalorder %s4600_s5, %s4596_s30 }
  0x28   :  { %p4603_p0 = por %p4602_p13, %p4601_p12 }
  0x2a   :  { %p4604_p1 = pnand %p4603_p0, %p4597_p11 }
  0x2c   :  { %4607 = shalt.err (!%p4604_p1)
}
  0x2d   :  { %95 = dma.hbm_to_vmem [thread:$0]  %s5798_s14, 16, %s93_s27, [#allocation10]  }
  0x2e   :  { %s4816_s22 = smov [#allocation12]   ;;  %s4817_s1 = smov [#allocation3]  }
  0x2f   :  { %s116_s23 = sshll.u32 %s4816_s22, 4  ;;  %s58_s24 = sshll.u32 %s4817_s1, 4  ;;  %s117_s23 = int_to_ptr.vmem [resolvable:$true] %s116_s23  ;;  %s59_s24 = int_to_ptr.vmem [resolvable:$true] %s58_s24 }
  0x30   :  { %s4608_s3 = scalar_lea.hbm %s5802_s18, 16 }
  0x31   :  { %p4609_p2 = scmp.ne.s32.totalorder %s5802_s18, %s4608_s3  ;;  %p4612_p3 = scmp.lt.u32.totalorder %s4608_s3, %s5802_s18 }
  0x33   :  { %p4614_p4 = pnand %p4612_p3, %p4609_p2 }
  0x35   :  { %4617 = shalt.err (!%p4614_p4)
}
  0x36   :  { %s4618_s14 = scalar_lea.vmem %s117_s23, 16  ;;  %s4622_s27 = scalar_lea.vmem %s117_s23, 32 }
  0x37   :  { %p4619_p5 = scmp.ne.s32.totalorder %s117_s23, %s4618_s14  ;;  %p4623_p6 = scmp.lt.s32.totalorder %s117_s23, %s117_s23 }
  0x38   :  { %p4624_p7 = scmp.lt.s32.totalorder %s4622_s27, %s4618_s14 }
  0x3a   :  { %p4625_p8 = por %p4624_p7, %p4623_p6 }
  0x3c   :  { %p4626_p9 = pnand %p4625_p8, %p4619_p5 }
  0x3e   :  { %4629 = shalt.err (!%p4626_p9)
}
  0x3f   :  { %119 = dma.hbm_to_vmem [thread:$0]  %s5802_s18, 16, %s117_s23, [#allocation13]  }
  0x40   :  { %s4630_s22 = scalar_lea.hbm %s5794_s10, 16 }
  0x41   :  { %p4631_p10 = scmp.ne.s32.totalorder %s5794_s10, %s4630_s22  ;;  %p4634_p11 = scmp.lt.u32.totalorder %s4630_s22, %s5794_s10 }
  0x43   :  { %p4636_p12 = pnand %p4634_p11, %p4631_p10 }
  0x45   :  { %4639 = shalt.err (!%p4636_p12)
}
  0x46   :  { %s4640_s28 = scalar_lea.vmem %s59_s24, 16  ;;  %s4644_s29 = scalar_lea.vmem %s59_s24, 32 }
  0x47   :  { %p4641_p13 = scmp.ne.s32.totalorder %s59_s24, %s4640_s28  ;;  %p4645_p0 = scmp.lt.s32.totalorder %s59_s24, %s59_s24 }
  0x48   :  { %p4646_p1 = scmp.lt.s32.totalorder %s4644_s29, %s4640_s28 }
  0x4a   :  { %p4647_p2 = por %p4646_p1, %p4645_p0 }
  0x4c   :  { %p4648_p3 = pnand %p4647_p2, %p4641_p13 }
  0x4e   :  { %4651 = shalt.err (!%p4648_p3)
}
  0x4f   :  { %61 = dma.hbm_to_vmem [thread:$0]  %s5794_s10, 16, %s59_s24, [#allocation4]  }
  0x50   :  { %s4818_s0 = smov [#allocation8]   ;;  %s4652_s30 = scalar_lea.hbm %s5797_s13, 512 }
  0x51   :  { %s79_s4 = sshll.u32 %s4818_s0, 4  ;;  %p4653_p4 = scmp.ne.s32.totalorder %s5797_s13, %s4652_s30  ;;  %s80_s4 = int_to_ptr.vmem [resolvable:$true] %s79_s4 }
  0x52   :  { %p4656_p5 = scmp.lt.u32.totalorder %s4652_s30, %s5797_s13 }
  0x54   :  { %p4658_p6 = pnand %p4656_p5, %p4653_p4 }
  0x56   :  { %4661 = shalt.err (!%p4658_p6)
}
  0x57   :  { %s4662_s1 = scalar_lea.vmem %s80_s4, 512  ;;  %p4667_p8 = scmp.lt.s32.totalorder %s80_s4, %s80_s4 }
  0x58   :  { %p4663_p7 = scmp.ne.s32.totalorder %s80_s4, %s4662_s1  ;;  %p4668_p9 = scmp.lt.s32.totalorder %s4662_s1, %s4662_s1 }
  0x5a   :  { %p4669_p10 = por %p4668_p9, %p4667_p8 }
  0x5c   :  { %p4670_p11 = pnand %p4669_p10, %p4663_p7 }
  0x5e   :  { %4673 = shalt.err (!%p4670_p11)
}
  0x5f   :  { %s4819_s10 = smov 128   ;;  %s4820_s24 = smov 8  }
  0x60   :  { %85 = dma.hbm_to_vmem [thread:$0]  %s5797_s13, 512, %s80_s4, [#allocation7], %s4819_s10, %s4819_s10, %s4820_s24  }
  0x61   :  { %s4821_s3 = smov [#allocation11]   ;;  %s4822_s29 = smov [#allocation14]  }
  0x62   :  { %s104_s28 = sshll.u32 %s4821_s3, 4  ;;  %s126_s18 = sshll.u32 %s4822_s29, 4  ;;  %s105_s28 = int_to_ptr.vmem [resolvable:$true] %s104_s28  ;;  %s127_s18 = int_to_ptr.vmem [resolvable:$true] %s126_s18 }
  0x63   :  { %s4674_s14 = scalar_lea.hbm %s5800_s16, 16 }
  0x64   :  { %p4675_p12 = scmp.ne.s32.totalorder %s5800_s16, %s4674_s14  ;;  %p4678_p13 = scmp.lt.u32.totalorder %s4674_s14, %s5800_s16 }
  0x66   :  { %p4680_p0 = pnand %p4678_p13, %p4675_p12 }
  0x68   :  { %4683 = shalt.err (!%p4680_p0)
}
  0x69   :  { %s4684_s13 = scalar_lea.vmem %s105_s28, 16  ;;  %s4688_s4 = scalar_lea.vmem %s105_s28, 32 }
  0x6a   :  { %p4685_p1 = scmp.ne.s32.totalorder %s105_s28, %s4684_s13  ;;  %p4689_p2 = scmp.lt.s32.totalorder %s105_s28, %s105_s28 }
  0x6b   :  { %p4690_p3 = scmp.lt.s32.totalorder %s4688_s4, %s4684_s13 }
  0x6d   :  { %p4691_p4 = por %p4690_p3, %p4689_p2 }
  0x6f   :  { %p4692_p5 = pnand %p4691_p4, %p4685_p1 }
  0x71   :  { %4695 = shalt.err (!%p4692_p5)
}
  0x72   :  { %107 = dma.hbm_to_vmem [thread:$0]  %s5800_s16, 16, %s105_s28, [#allocation10]  }
  0x73   :  { %s4696_s26 = scalar_lea.hbm %s5803_s19, 16 }
  0x74   :  { %p4697_p6 = scmp.ne.s32.totalorder %s5803_s19, %s4696_s26  ;;  %p4700_p7 = scmp.lt.u32.totalorder %s4696_s26, %s5803_s19 }
  0x76   :  { %p4702_p8 = pnand %p4700_p7, %p4697_p6 }
  0x78   :  { %4705 = shalt.err (!%p4702_p8)
}
  0x79   :  { %s4706_s14 = scalar_lea.vmem %s127_s18, 16  ;;  %s4710_s27 = scalar_lea.vmem %s127_s18, 32 }
  0x7a   :  { %p4707_p9 = scmp.ne.s32.totalorder %s127_s18, %s4706_s14  ;;  %p4711_p10 = scmp.lt.s32.totalorder %s127_s18, %s127_s18 }
  0x7b   :  { %p4712_p11 = scmp.lt.s32.totalorder %s4710_s27, %s4706_s14 }
  0x7d   :  { %p4713_p12 = por %p4712_p11, %p4711_p10 }
  0x7f   :  { %p4714_p13 = pnand %p4713_p12, %p4707_p9 }
  0x81   :  { %4717 = shalt.err (!%p4714_p13)
}
  0x82   :  { %129 = dma.hbm_to_vmem [thread:$0]  %s5803_s19, 16, %s127_s18, [#allocation13]  }
  0x83   :  { %s4823_s30 = smov [#allocation15]   ;;  %s4718_s4 = scalar_lea.hbm %s5804_s20, 16 }
  0x84   :  { %s136_s5 = sshll.u32 %s4823_s30, 4  ;;  %p4719_p0 = scmp.ne.s32.totalorder %s5804_s20, %s4718_s4  ;;  %s137_s5 = int_to_ptr.vmem [resolvable:$true] %s136_s5 }
  0x85   :  { %p4722_p1 = scmp.lt.u32.totalorder %s4718_s4, %s5804_s20 }
  0x87   :  { %p4724_p2 = pnand %p4722_p1, %p4719_p0 }
  0x89   :  { %4727 = shalt.err (!%p4724_p2)
}
  0x8a   :  { %s4728_s26 = scalar_lea.vmem %s137_s5, 16  ;;  %s4732_s19 = scalar_lea.vmem %s137_s5, 32 }
  0x8b   :  { %p4729_p3 = scmp.ne.s32.totalorder %s137_s5, %s4728_s26  ;;  %p4733_p4 = scmp.lt.s32.totalorder %s137_s5, %s137_s5 }
  0x8c   :  { %p4734_p5 = scmp.lt.s32.totalorder %s4732_s19, %s4728_s26 }
  0x8e   :  { %p4735_p6 = por %p4734_p5, %p4733_p4 }
  0x90   :  { %p4736_p7 = pnand %p4735_p6, %p4729_p3 }
  0x92   :  { %4739 = shalt.err (!%p4736_p7)
}
  0x93   :  { %139 = dma.hbm_to_vmem [thread:$0]  %s5804_s20, 16, %s137_s5, [#allocation16]  }
  0x94   :  { %4782 = dma.done.wait [#allocation4], 16  }
  0x95   :  { %4783 = vsyncadd [#allocation4], 4294967280 }
  0x96   :  { %4784 = dma.done.wait [#allocation7], 528  }
  0x97   :  { %4785 = vsyncadd [#allocation7], 4294966768 }
  0x98   :  { %4786 = dma.done.wait [#allocation10], 32  }
  0x99   :  { %4787 = vsyncadd [#allocation10], 4294967264 }
  0x9a   :  { %4788 = dma.done.wait [#allocation13], 32  }
  0x9b   :  { %4789 = vsyncadd [#allocation13], 4294967264 }
  0x9c   :  { %4790 = dma.done.wait [#allocation16], 16  }
  0x9d   :  { %4791 = vsyncadd [#allocation16], 4294967280  ;;  %s5815_s0 = sld [smem:[#allocation24_spill]]  ;;  %s5816_s28 = sld [smem:[#allocation26_spill]]  ;;  %v5092_v10 = vld [vmem:[%s5790_s6] sm:$0xff]  ;;  %v5097_v11 = vld [vmem:[%s5790_s6 + $0x8] sm:$0xff] }
  0x9e   :  { %s5817_s2 = sld [smem:[#allocation28_spill]]  ;;  %v5102_v12 = vld [vmem:[%s5790_s6 + $0x10] sm:$0xff]  ;;  %v5107_v13 = vld [vmem:[%s5790_s6 + $0x18] sm:$0xff]  ;;  %v5112_v14 = vld [vmem:[%s5792_s8] sm:$0xff]  ;;  %s5818_s18 = sld [smem:[#allocation27_spill]] }
  0x9f   :  { %v5117_v15 = vld [vmem:[%s5792_s8 + $0x8] sm:$0xff]  ;;  %v5122_v16 = vld [vmem:[%s5792_s8 + $0x10] sm:$0xff]  ;;  %v5127_v17 = vld [vmem:[%s5792_s8 + $0x18] sm:$0xff]  ;;  %s5819_s23 = sld [smem:[#allocation29_spill]]  ;;  %s5155_s8 = smov 0  }
  0xa0   :  { %v5142_v20 = vld [vmem:[%s5791_s7] ss:$0 sm:$0xff] }
  0xa1   :  { %v5147_v21 = vld [vmem:[%s5793_s9] ss:$0 sm:$0xff] }
  0xa3   :  { %v5042_v0 = vld [vmem:[%s5815_s0] sm:$0xff]   ;;  %v5047_v1 = vld [vmem:[%s5815_s0 + $0x8] sm:$0xff]   ;;  %v5062_v4 = vld [vmem:[%s5816_s28 + $0x10] sm:$0xff] }
  0xa4   :  { %v5052_v2 = vld [vmem:[%s5816_s28] sm:$0xff]  ;;  %v5057_v3 = vld [vmem:[%s5816_s28 + $0x8] sm:$0xff]  ;;  %v5067_v5 = vld [vmem:[%s5816_s28 + $0x18] sm:$0xff]  ;;  %v5820_v22 = vmov %v5047_v1  ;;  %v5821_v23 = vmov %v5042_v0 }
  0xa5   :  { %v5072_v6 = vld [vmem:[%s5817_s2] sm:$0xff]  ;;  %v5077_v7 = vld [vmem:[%s5817_s2 + $0x8] sm:$0xff]  ;;  %v5082_v8 = vld [vmem:[%s5817_s2 + $0x10] sm:$0xff] }
  0xa6   :  { %v5087_v9 = vld [vmem:[%s5817_s2 + $0x18] sm:$0xff]  ;;  %v5132_v18 = vld [vmem:[%s5818_s18] ss:$0 sm:$0xff] }
  0xa7   :  { %v5137_v19 = vld [vmem:[%s5819_s23] ss:$0 sm:$0xff] }
  0xa8 LB: > { %v5168_v24 = vpack.c.bf16 %v5057_v3, %v5052_v2  ;;  %v5172_v25 = vpack.c.bf16 %v5067_v5, %v5062_v4  ;;  %vm218_vm0 = vcmask 261120   ;;  %v5176_v26 = vpack.c.bf16 %v5077_v7, %v5072_v6  ;;  %s215_s8 = sadd.s32 1, %s4804_s8   ;;  %s4804_s8 = sphi %s5155_s8, %s215_s8   ;;  %v4800_v23 = vphi %v5821_v23, %v5823_v23   ;;  %v4796_v22 = vphi %v5820_v22, %v5822_v22  }
  0xa9   : > { %3764 = vmatprep.mubr.msk.f32.mxu0 %vm218_vm0, %v4800_v23  ;;  %v5190_v27 = vpack.c.bf16 %v5087_v9, %v5082_v8  ;;  %v5197_v28 = vpack.c.bf16 %v5097_v11, %v5092_v10  ;;  %v5211_v35 = vpack.c.bf16 %v5107_v13, %v5102_v12  ;;  %p212_p8 = scmp.ge.s32.totalorder %s215_s8, 8  }
  0xaa   : > { %4211 = vmatprep.subr.bf16.mxu0 %v5168_v24  ;;  %4219 = vmatprep.subr.bf16.mxu1 %v5176_v26  ;;  %vm1370_vm1 = vcmask (%p212_p8), 336896   ;;  %s5824_s16 = sld [smem:[#allocation25_spill]] (%p212_p8)  ;;  %vm1373_vm2 = vcmask (%p212_p8), 254976   ;;  %v5324_v3 = vld [vmem:[%s5795_s11] sm:$0xff] (%p212_p8)  ;;  %v5329_v4 = vld [vmem:[%s5795_s11 + $0x8] sm:$0xff] (%p212_p8)  ;;  %v5334_v5 = vld [vmem:[%s5795_s11 + $0x10] sm:$0xff] (%p212_p8) }
  0xab   : > { %4213 = vmatpush3.bf16.msra.mxu0 %v5168_v24  ;;  %4221 = vmatpush3.bf16.msra.mxu1 %v5176_v26  ;;  %v5339_v6 = vld [vmem:[%s5795_s11 + $0x18] sm:$0xff] (%p212_p8)  ;;  %v5344_v7 = vld [vmem:[%s5795_s11 + $0x20] sm:$0xff] (%p212_p8)  ;;  %v5349_v8 = vld [vmem:[%s5795_s11 + $0x28] sm:$0x3] (%p212_p8) }
  0xac   : > { %4215 = vmatprep.subr.bf16.mxu0 %v5172_v25  ;;  %4223 = vmatprep.subr.bf16.mxu1 %v5190_v27  ;;  %v5351_v9 = vld [vmem:[#allocation8] sm:$0xff] (%p212_p8)  ;;  %v5353_v10 = vld [vmem:[#allocation8 + $0x8] sm:$0xff] (%p212_p8)  ;;  %v5355_v11 = vld [vmem:[#allocation8 + $0x10] sm:$0xff] (%p212_p8) }
  0xad   :  { %v5357_v12 = vld [vmem:[#allocation8 + $0x18] sm:$0xff] (%p212_p8)  ;;  %v5362_v13 = vld [vmem:[%s5799_s15] sm:$0xff] (%p212_p8) }
  0xaf   : > { %4217 = vmatpush3.bf16.msra.mxu0 %v5172_v25  ;;  %4225 = vmatpush3.bf16.msra.mxu1 %v5190_v27 }
  0xb0   : > { %4235 = vmatprep.subr.bf16.mxu1 %v5168_v24  ;;  %4227 = vmatprep.subr.bf16.mxu0 %v5197_v28  ;;  %v1372_v2 = vld [vmem:[%s5824_s16] sm:$0x3] (%p212_p8) }
  0xb2   : > { %3765 = vmatmul.mubr.msk.f32.vlgmr.msra.gmra.mrb[0].mxu0 %vm218_vm0, %v4796_v22 }
  0xb3   : > { %4229 = vmatpush3.bf16.msra.mxu0 %v5197_v28 }
  0xb4   : > { %4231 = vmatprep.subr.bf16.mxu0 %v5211_v35 }
  0xb7   : > { %4233 = vmatpush3.bf16.msra.mxu0 %v5211_v35 }
  0xb8   : > { %4243 = vmatprep.subr.bf16.mxu0 %v5176_v26 }
 0x185   : > { %v3766_v29 = vpop.f32.mrb[0].mxu0 }
 0x186   : > { %v297_v30 = vadd.f32 %v3766_v29, %v5132_v18  ;;  %v291_v31 = vpop.f32.mrb[1].mxu0 }
 0x187   : > { %v292_v32 = vadd.f32 %v5132_v18, %v291_v31 }
 0x188   : > { %v301_v34 = vmax.f32 %v297_v30, 0.0 }
 0x189   : > { %v300_v33 = vmax.f32 %v292_v32, 0.0 }
 0x18b   : > { %3775 = vmatprep.mubr.msk.f32.mxu1 %vm218_vm0, %v300_v33 }
 0x18c   : > { %3776 = vmatmul.mubr.msk.f32.vlgmr.msra.gmra.mrb[0].mxu1 %vm218_vm0, %v301_v34 }
 0x18d   : > { %4237 = vmatpush3.bf16.msra.mxu1 %v5168_v24 }
 0x18e   : > { %4239 = vmatprep.subr.bf16.mxu1 %v5172_v25 }
 0x191   : > { %4241 = vmatpush3.bf16.msra.mxu1 %v5172_v25 }
 0x192   : > { %4251 = vmatprep.subr.bf16.mxu1 %v5197_v28 }
 0x25f   : > { %v3777_v36 = vpop.f32.mrb[0].mxu1 }
 0x260   : > { %v380_v37 = vadd.f32 %v3777_v36, %v5137_v19  ;;  %v374_v38 = vpop.f32.mrb[1].mxu1 }
 0x261   : > { %v375_v39 = vadd.f32 %v5137_v19, %v374_v38 }
 0x262   : > { %v384_v41 = vmax.f32 %v380_v37, 0.0 }
 0x263   : > { %v383_v40 = vmax.f32 %v375_v39, 0.0 }
 0x265   : > { %3786 = vmatprep.mubr.msk.f32.mxu0 %vm218_vm0, %v383_v40 }
 0x266   : > { %3787 = vmatmul.mubr.msk.f32.vlgmr.msra.gmra.mrb[2].mxu0 %vm218_vm0, %v384_v41 }
 0x267   : > { %4245 = vmatpush3.bf16.msra.mxu0 %v5176_v26 }
 0x268   : > { %4247 = vmatprep.subr.bf16.mxu0 %v5190_v27 }
 0x26b   : > { %4249 = vmatpush3.bf16.msra.mxu0 %v5190_v27 }
 0x26c   : > { %4259 = vmatprep.subr.bf16.mxu0 %v5168_v24 }
 0x339   : > { %v3788_v42 = vpop.f32.mrb[2].mxu0 }
 0x33a   : > { %v5225_v43 = vadd.f32 %v3788_v42, %v5142_v20  ;;  %v457_v44 = vpop.f32.mrb[3].mxu0 }
 0x33b   : > { %v5228_v45 = vadd.f32 %v5142_v20, %v457_v44 }
 0x33c   : > { %v467_v46 = vmul.f32 0.0625, %v5225_v43 }
 0x33d   : > { %v466_v47 = vmul.f32 0.0625, %v5228_v45 }
 0x33e   : > { %v469_v49 = vadd.f32 %v4796_v22, %v467_v46 }
 0x33f   : > { %v468_v48 = vadd.f32 %v4800_v23, %v466_v47 }
 0x341   : > { %3797 = vmatprep.mubr.msk.f32.mxu1 %vm218_vm0, %v468_v48 }
 0x342   : > { %3798 = vmatmul.mubr.msk.f32.vlgmr.msra.gmra.mrb[2].mxu1 %vm218_vm0, %v469_v49 }
 0x343   : > { %4253 = vmatpush3.bf16.msra.mxu1 %v5197_v28 }
 0x344   : > { %4255 = vmatprep.subr.bf16.mxu1 %v5211_v35 }
 0x347   : > { %4257 = vmatpush3.bf16.msra.mxu1 %v5211_v35 }
 0x348   : > { %4267 = vmatprep.subr.bf16.mxu1 %v5176_v26 }
 0x415   : > { %v3799_v50 = vpop.f32.mrb[2].mxu1 }
 0x416   : > { %v548_v51 = vadd.f32 %v3799_v50, %v5132_v18  ;;  %v542_v52 = vpop.f32.mrb[3].mxu1 }
 0x417   : > { %v543_v53 = vadd.f32 %v5132_v18, %v542_v52 }
 0x418   : > { %v552_v55 = vmax.f32 %v548_v51, 0.0 }
 0x419   : > { %v551_v54 = vmax.f32 %v543_v53, 0.0 }
 0x41b   : > { %3808 = vmatprep.mubr.msk.f32.mxu0 %vm218_vm0, %v551_v54 }
 0x41c   : > { %3809 = vmatmul.mubr.msk.f32.vlgmr.msra.gmra.mrb[4].mxu0 %vm218_vm0, %v552_v55 }
 0x41d   : > { %4261 = vmatpush3.bf16.msra.mxu0 %v5168_v24 }
 0x41e   : > { %4263 = vmatprep.subr.bf16.mxu0 %v5172_v25 }
 0x421   : > { %4265 = vmatpush3.bf16.msra.mxu0 %v5172_v25 }
 0x422   : > { %4275 = vmatprep.subr.bf16.mxu0 %v5197_v28 }
 0x4ef   : > { %v3810_v56 = vpop.f32.mrb[4].mxu0 }
 0x4f0   : > { %v631_v57 = vadd.f32 %v3810_v56, %v5137_v19  ;;  %v625_v58 = vpop.f32.mrb[5].mxu0 }
 0x4f1   : > { %v626_v59 = vadd.f32 %v5137_v19, %v625_v58 }
 0x4f2   : > { %v635_v61 = vmax.f32 %v631_v57, 0.0 }
 0x4f3   : > { %v634_v60 = vmax.f32 %v626_v59, 0.0 }
 0x4f5   : > { %3819 = vmatprep.mubr.msk.f32.mxu1 %vm218_vm0, %v634_v60 }
 0x4f6   : > { %3820 = vmatmul.mubr.msk.f32.vlgmr.msra.gmra.mrb[4].mxu1 %vm218_vm0, %v635_v61 }
 0x4f7   : > { %4269 = vmatpush3.bf16.msra.mxu1 %v5176_v26 }
 0x4f8   : > { %4271 = vmatprep.subr.bf16.mxu1 %v5190_v27 }
 0x4fb   : > { %4273 = vmatpush3.bf16.msra.mxu1 %v5190_v27 }
 0x4fc   : > { %4283 = vmatprep.subr.bf16.mxu1 %v5168_v24 }
 0x5c9   : > { %v3821_v62 = vpop.f32.mrb[4].mxu1 }
 0x5ca   : > { %v714_v63 = vadd.f32 %v3821_v62, %v5142_v20  ;;  %v708_v29 = vpop.f32.mrb[5].mxu1 }
 0x5cb   : > { %v709_v30 = vadd.f32 %v5142_v20, %v708_v29 }
 0x5cc   : > { %v718_v31 = vmul.f32 0.0625, %v714_v63 }
 0x5cd   : > { %v717_v32 = vmul.f32 0.0625, %v709_v30 }
 0x5ce   : > { %v720_v34 = vadd.f32 %v4796_v22, %v718_v31 }
 0x5cf   : > { %v719_v33 = vadd.f32 %v4800_v23, %v717_v32 }
 0x5d1   : > { %3830 = vmatprep.mubr.msk.f32.mxu0 %vm218_vm0, %v719_v33 }
 0x5d2   : > { %3831 = vmatmul.mubr.msk.f32.vlgmr.msra.gmra.mrb[6].mxu0 %vm218_vm0, %v720_v34 }
 0x5d3   : > { %4277 = vmatpush3.bf16.msra.mxu0 %v5197_v28 }
 0x5d4   : > { %4279 = vmatprep.subr.bf16.mxu0 %v5211_v35 }
 0x5d7   : > { %4281 = vmatpush3.bf16.msra.mxu0 %v5211_v35 }
 0x5d8   : > { %4291 = vmatprep.subr.bf16.mxu0 %v5176_v26 }
 0x6a5   : > { %v3832_v36 = vpop.f32.mrb[6].mxu0 }
 0x6a6   : > { %v799_v37 = vadd.f32 %v3832_v36, %v5132_v18  ;;  %v793_v38 = vpop.f32.mrb[7].mxu0 }
 0x6a7   : > { %v794_v39 = vadd.f32 %v5132_v18, %v793_v38 }
 0x6a8   : > { %v803_v41 = vmax.f32 %v799_v37, 0.0 }
 0x6a9   : > { %v802_v40 = vmax.f32 %v794_v39, 0.0 }
 0x6ab   : > { %3841 = vmatprep.mubr.msk.f32.mxu1 %vm218_vm0, %v802_v40 }
 0x6ac   : > { %3842 = vmatmul.mubr.msk.f32.vlgmr.msra.gmra.mrb[6].mxu1 %vm218_vm0, %v803_v41 }
 0x6ad   : > { %4285 = vmatpush3.bf16.msra.mxu1 %v5168_v24  ;;  %v1220_v24 = vmul.f32 2.0, %v714_v63 }
 0x6ae   : > { %4287 = vmatprep.subr.bf16.mxu1 %v5172_v25 }
 0x6af   : > { %v1222_v54 = vadd.f32 %v1220_v24, %v5225_v43  ;;  %v5407_v24 = vld [vmem:[%s5801_s17 + $0x28] sm:$0x3] (%p212_p8) }
 0x6b1   : > { %4289 = vmatpush3.bf16.msra.mxu1 %v5172_v25  ;;  %v1219_v25 = vmul.f32 2.0, %v709_v30 }
 0x6b2   : > { %4299 = vmatprep.subr.bf16.mxu1 %v5197_v28 }
 0x6b3   : > { %v1221_v57 = vadd.f32 %v1219_v25, %v5228_v45  ;;  %v5409_v25 = vld [vmem:[#allocation3] ss:$0 sm:$0xff] (%p212_p8) }
 0x77f   : > { %v3843_v42 = vpop.f32.mrb[6].mxu1 }
 0x780   : > { %v882_v44 = vadd.f32 %v3843_v42, %v5137_v19  ;;  %v876_v46 = vpop.f32.mrb[7].mxu1 }
 0x781   : > { %v877_v47 = vadd.f32 %v5137_v19, %v876_v46 }
 0x782   : > { %v886_v49 = vmax.f32 %v882_v44, 0.0 }
 0x783   : > { %v885_v48 = vmax.f32 %v877_v47, 0.0 }
 0x785   : > { %3852 = vmatprep.mubr.msk.f32.mxu0 %vm218_vm0, %v885_v48  ;;  %v4306_v48 = vpack.c.bf16 (%p212_p8), %v5117_v15, %v5112_v14  ;;  %v5367_v14 = vld [vmem:[%s5799_s15 + $0x8] sm:$0xff] (%p212_p8)  ;;  %v5372_v15 = vld [vmem:[%s5799_s15 + $0x10] sm:$0xff] (%p212_p8) }
 0x786   : > { %3853 = vmatmul.mubr.msk.f32.vlgmr.msra.gmra.mrb[8].mxu0 %vm218_vm0, %v886_v49  ;;  %v4310_v49 = vpack.c.bf16 (%p212_p8), %v5127_v17, %v5122_v16  ;;  %v5377_v16 = vld [vmem:[%s5799_s15 + $0x18] sm:$0xff] (%p212_p8)  ;;  %v5382_v17 = vld [vmem:[%s5801_s17] sm:$0xff] (%p212_p8) }
 0x787   : > { %4293 = vmatpush3.bf16.msra.mxu0 %v5176_v26 }
 0x788   : > { %4295 = vmatprep.subr.bf16.mxu0 %v5190_v27 }
 0x78b   : > { %4297 = vmatpush3.bf16.msra.mxu0 %v5190_v27 }
 0x78c   :  { %4307 = vmatprep.subr.bf16.mxu0 (%p212_p8), %v4306_v48 }
 0x859   : > { %v3854_v50 = vpop.f32.mrb[8].mxu0 }
 0x85a   : > { %v965_v51 = vadd.f32 %v3854_v50, %v5142_v20  ;;  %v959_v52 = vpop.f32.mrb[9].mxu0  ;;  %v5411_v50 = vld [vmem:[#allocation6] ss:$0 sm:$0xff] (%p212_p8) }
 0x85b   : > { %v960_v53 = vadd.f32 %v5142_v20, %v959_v52  ;;  %v5415_v52 = vld [vmem:[#allocation11] ss:$0 sm:$0xff] (%p212_p8) }
 0x85c   : > { %v969_v55 = vmul.f32 0.125, %v965_v51  ;;  %v1224_v56 = vmul.f32 2.0, %v965_v51  ;;  %v5413_v51 = vld [vmem:[#allocation9] ss:$0 sm:$0xff] (%p212_p8) }
 0x85d   : > { %v968_v58 = vmul.f32 0.125, %v960_v53  ;;  %v1223_v26 = vmul.f32 2.0, %v960_v53  ;;  %v5417_v53 = vld [vmem:[#allocation12] ss:$0 sm:$0xff] (%p212_p8) }
 0x85e   : > { %v1226_v59 = vadd.f32 %v1224_v56, %v1222_v54  ;;  %v971_v61 = vadd.f32 %v4796_v22, %v969_v55 }
 0x85f   : > { %v970_v60 = vadd.f32 %v4800_v23, %v968_v58  ;;  %v1225_v27 = vadd.f32 %v1223_v26, %v1221_v57 }
 0x861   : > { %3863 = vmatprep.mubr.msk.f32.mxu1 %vm218_vm0, %v970_v60 }
 0x862   : > { %3864 = vmatmul.mubr.msk.f32.vlgmr.msra.gmra.mrb[8].mxu1 %vm218_vm0, %v971_v61 }
 0x863   : > { %4301 = vmatpush3.bf16.msra.mxu1 %v5197_v28 }
 0x864   : > { %4303 = vmatprep.subr.bf16.mxu1 %v5211_v35 }
 0x867   : > { %4305 = vmatpush3.bf16.msra.mxu1 %v5211_v35 }
 0x935   : > { %v3865_v43 = vpop.f32.mrb[8].mxu1 }
 0x936   : > { %v1050_v45 = vadd.f32 %v3865_v43, %v5132_v18  ;;  %v1044_v62 = vpop.f32.mrb[9].mxu1 }
 0x937   : > { %v1045_v63 = vadd.f32 %v5132_v18, %v1044_v62  ;;  %v5387_v18 = vld [vmem:[%s5801_s17 + $0x8] sm:$0xff] (%p212_p8) }
 0x938   : > { %v1054_v30 = vmax.f32 %v1050_v45, 0.0 }
 0x939   : > { %v1053_v29 = vmax.f32 %v1045_v63, 0.0 }
 0x93b   : > { %3874 = vmatprep.mubr.msk.f32.mxu0 %vm218_vm0, %v1053_v29 }
 0x93c   : > { %3875 = vmatmul.mubr.msk.f32.vlgmr.msra.gmra.mrb[10].mxu0 %vm218_vm0, %v1054_v30 }
 0x93d   :  { %4309 = vmatpush3.bf16.msra.mxu0 (%p212_p8), %v4306_v48 }
 0x93e   :  { %4311 = vmatprep.subr.bf16.mxu0 (%p212_p8), %v4310_v49 }
 0x941   :  { %4313 = vmatpush3.bf16.msra.mxu0 (%p212_p8), %v4310_v49 }
 0xa0f   : > { %v3876_v31 = vpop.f32.mrb[10].mxu0 }
 0xa10   : > { %v1133_v32 = vadd.f32 %v3876_v31, %v5137_v19  ;;  %v1127_v28 = vpop.f32.mrb[11].mxu0 }
 0xa11   : > { %v1128_v33 = vadd.f32 %v5137_v19, %v1127_v28  ;;  %v5392_v19 = vld [vmem:[%s5801_s17 + $0x10] sm:$0xff] (%p212_p8) }
 0xa12   : > { %v1137_v35 = vmax.f32 %v1133_v32, 0.0 }
 0xa13   : > { %v1136_v34 = vmax.f32 %v1128_v33, 0.0 }
 0xa15   : > { %3885 = vmatprep.mubr.msk.f32.mxu1 %vm218_vm0, %v1136_v34 }
 0xa16   : > { %3886 = vmatmul.mubr.msk.f32.vlgmr.msra.gmra.mrb[10].mxu1 %vm218_vm0, %v1137_v35 }
 0xae9   : > { %v3887_v36 = vpop.f32.mrb[10].mxu1 }
 0xaea   : > { %v1216_v37 = vadd.f32 %v3887_v36, %v5142_v20  ;;  %v1210_v38 = vpop.f32.mrb[11].mxu1 }
 0xaeb   : > { %v1211_v39 = vadd.f32 %v5142_v20, %v1210_v38  ;;  %v5397_v20 = vld [vmem:[%s5801_s17 + $0x18] sm:$0xff] (%p212_p8) }
 0xaec   : > { %v1228_v40 = vadd.f32 %v1226_v59, %v1216_v37 }
 0xaed   : > { %v1227_v41 = vadd.f32 %v1225_v27, %v1211_v39  ;;  %214 = sbr.rel (!%p212_p8) target bundleno = 168 (0xa8), region = 151 }
 0xaee   : > { %v1230_v42 = vmul.f32 0.020833334, %v1228_v40 }
 0xaef   : > { %v1229_v44 = vmul.f32 0.020833334, %v1227_v41 }
 0xaf0   : > { %v1232_v46 = vadd.f32 %v4796_v22, %v1230_v42  }
 0xaf1   : > { %v1231_v47 = vadd.f32 %v4800_v23, %v1229_v44  }
 0xaf2   : > { %v5822_v22 = vmov %v1232_v46 }
 0xaf3   : > { %v5823_v23 = vmov %v1231_v47  ;;  %3896 = vmatprep.mubr.msk.f32.mxu0 (%p212_p8), %vm218_vm0, %v1231_v47  ;;  %v5402_v22 = vld [vmem:[%s5801_s17 + $0x20] sm:$0xff] (%p212_p8)  ;;  %s5427_s17 = smov (%p212_p8), 1  }
 0xaf4   :  { %3897 = vmatmul.mubr.msk.f32.vlgmr.msra.gmra.mrb[0].mxu0 %vm218_vm0, %v1232_v46  ;;  %v4824_v23 = vmov 0.0  }
 0xaf5   :  { %1371 = vst.msk [vmem:[#allocation2] sm:$0x3] %vm1370_vm1, %v4824_v23 }
 0xaf6   :  { %1374 = vst.msk [vmem:[#allocation2] sm:$0x3] %vm1373_vm2, %v1372_v2 }
 0xafd   :  { %v1375_v54 = vld [vmem:[#allocation2] sm:$0x3]  }
 0xbc7   :  { %v3898_v55 = vpop.f32.mrb[0].mxu0 }
 0xbc8   :  { %v5420_v56 = vadd.f32 %v3898_v55, %v5147_v21  ;;  %v1306_v57 = vpop.f32.mrb[1].mxu0 }
 0xbc9   :  { %v5423_v58 = vadd.f32 %v5147_v21, %v1306_v57 }
 0xbca LB: > { %v5437_v26 = vpack.c.bf16 %v5329_v4, %v5324_v3  ;;  %v4825_v59 = vmov 0.0|0.0   ;;  %v5444_v21 = vpack.c.bf16 %v5339_v6, %v5334_v5  ;;  %vm4826_vm3 = vmmov 0   ;;  %s3495_s4 = sadd.s32 4294967295, %s4812_s17  ;;  %s3528_s19 = sshll.u32 %s4812_s17, 1  ;;  %s4812_s17 = sphi %s5427_s17, %s1381_s17   ;;  %v4808_v54 = vphi %v1375_v54, %v3208_v54  }
 0xbcb   : > { %4314 = vmatprep.subr.bf16.mxu0 %v4825_v59  ;;  %4324 = vmatprep.subr.bf16.mxu1 %v4825_v59  ;;  %v4827_v60 = vmov 0.0   ;;  %v5450_v27 = vpack.c.bf16 %v5353_v10, %v5351_v9  ;;  %vm1394_vm4 = vcmask 1041408   ;;  %v5460_v61 = vpack.c.bf16 %v5349_v8, %v5344_v7  ;;  %s1384_s25 = scvt.s32.f32 %s3495_s4  ;;  %s3210_s18 = scalar_lea.vmem [#allocation2], %s3528_s19 }
 0xbcc   : > { %4316 = vmatpush3.bf16.msra.mxu0 %v5437_v26  ;;  %3911 = vmatprep.mubr.msk.f32.mxu0 %vm4826_vm3, %v4827_v60  ;;  %vm4828_vm5 = vmmov 1   ;;  %vm1390_vm7 = vcmask 343040   ;;  %v5485_v45 = vpack.c.bf16 %v5357_v12, %v5355_v11  ;;  %v5497_v28 = vpack.c.bf16 %v5367_v14, %v5362_v13  ;;  %s1381_s17 = sadd.s32 1, %s4812_s17  }
 0xbcd   : > { %4317 = vmatprep.subr.bf16.mxu0 %v4825_v59  ;;  %3922 = vmatprep.mubr.msk.f32.mxu1 %vm4826_vm3, %v4827_v60  ;;  %vm5463_vm6 = vmpackc.low %vm1394_vm4, %vm4828_vm5  ;;  %s5490_s22 = smul.f32 0.14285715, %s1384_s25  ;;  %v5506_v34 = vpack.c.bf16 %v5377_v16, %v5372_v15  ;;  %p1378_p9 = scmp.ge.s32.totalorder %s1381_s17, 8  }
 0xbce   : > { %4326 = vmatpush3.bf16.msra.mxu1 %v5450_v27  ;;  %vm3237_vm8 = vcmask (%p1378_p9), 1041409   ;;  %vm3240_vm9 = vcmask (%p1378_p9), 1042434   ;;  %vm3243_vm10 = vcmask (%p1378_p9), 1043459   ;;  %vm3246_vm11 = vcmask (%p1378_p9), 1044484   ;;  %s4829_s3 = smov (%p1378_p9), [#allocation17]  }
 0xbcf   : > { %4327 = vmatprep.subr.bf16.mxu1 %v4825_v59  ;;  %v1387_v62 = vstv %s5490_s22  ;;  %s1616_s1 = sadd.f32 0.035714287, %s5490_s22  ;;  %vm3249_vm12 = vcmask (%p1378_p9), 1045509   ;;  %vm3252_vm13 = vcmask (%p1378_p9), 1046534   ;;  %vm3255_vm14 = vcmask (%p1378_p9), 1047559   ;;  %s3423_s29 = sshll.u32 (%p1378_p9), %s4829_s3, 4  ;;  %s3424_s29 = int_to_ptr.vmem [resolvable:$true] %s3423_s29 }
 0xbd0   : > { %4319 = vmatpush3.bf16.msra.mxu0 %v5444_v21  ;;  %v1388_v63 = vmul.f32 %v5409_v25, %v1387_v62  ;;  %s5591_s2 = sadd.f32 0.071428575, %s5490_s22  ;;  %s4740_s11 = scalar_lea.vmem (%p1378_p9), %s3424_s29, 256 }
 0xbd1   : > { %4320 = vmatprep.subr.bf16.mxu0 %v4825_v59  ;;  %v1619_v46 = vstv %s1616_s1  ;;  %p4741_p10 = scmp.ne.s32.totalorder (%p1378_p9), %s3424_s29, %s4740_s11  ;;  %p4745_p11 = scmp.lt.s32.totalorder (%p1378_p9), %s3424_s29, %s3424_s29 }
 0xbd2   : > { %4329 = vmatpush3.bf16.msra.mxu1 %v5485_v45  ;;  %v1389_v29 = vadd.f32 %v5411_v50, %v1388_v63  ;;  %v1620_v47 = vmul.f32 %v5409_v25, %v1619_v46  ;;  %s2525_s26 = sadd.f32 0.035714287, %s5591_s2  ;;  %p4746_p12 = scmp.lt.s32.totalorder (%p1378_p9), %s4740_s11, %s4740_s11 }
 0xbd3   : > { %4330 = vmatprep.subr.bf16.mxu1 %v4825_v59  ;;  %s2975_s6 = sadd.f32 0.071428575, %s5591_s2 }
 0xbd4   : > { %4323 = vmatpush3.bf16.msk.msra.mxu0 %vm5463_vm6, %v5460_v61  ;;  %v1621_v48 = vadd.f32 %v5411_v50, %v1620_v47  ;;  %p4747_p13 = por (%p1378_p9), %p4746_p12, %p4745_p11 }
 0xbd5   : > { %4336 = vmatprep.subr.bf16.mxu0 %v4825_v59 }
 0xbd6   :  { %p4748_p0 = pnand (%p1378_p9), %p4747_p13, %p4741_p10 }
 0xbd7   : > { %3912 = vmatmul.mubr.msk.f32.vlgmr.msra.gmra.mrb[0].mxu0 %vm1390_vm7, %v4808_v54 }
 0xbd8   : > { %4338 = vmatpush3.bf16.msra.mxu0 %v5437_v26  ;;  %3948 = vmatprep.mubr.msk.f32.mxu0 %vm4826_vm3, %v4827_v60 }
 0xbd9   : > { %4339 = vmatprep.subr.bf16.mxu0 %v4825_v59 }
 0xbdc   : > { %4341 = vmatpush3.bf16.msra.mxu0 %v5444_v21 }
 0xbdd   : > { %4342 = vmatprep.subr.bf16.mxu0 %v4825_v59 }
 0xbe0   : > { %4345 = vmatpush3.bf16.msk.msra.mxu0 %vm5463_vm6, %v5460_v61 }
 0xbe1   : > { %4352 = vmatprep.subr.bf16.mxu0 %v4825_v59 }
 0xcaa   : > { %v1464_v30 = vpop.f32.mrb[0].mxu0 }
 0xcab   : > { %v1465_v31 = vadd.f32 %v1464_v30, %v1389_v29  ;;  %v3913_v32 = vpop.f32.mrb[1].mxu0 }
 0xcad   : > { %v1468_v33 = vmax.f32 %v1465_v31, 0.0 }
 0xcaf   : > { %3923 = vmatmul.mubr.msk.f32.vlgmr.msra.gmra.mrb[0].mxu1 %vm218_vm0, %v1468_v33 }
 0xcb0   : > { %4332 = vmatpush3.bf16.msra.mxu1 %v5497_v28  ;;  %3933 = vmatprep.mubr.msk.f32.mxu1 %vm4826_vm3, %v4827_v60 }
 0xcb1   : > { %4333 = vmatprep.subr.bf16.mxu1 %v4825_v59 }
 0xcb4   : > { %4335 = vmatpush3.bf16.msra.mxu1 %v5506_v34 }
 0xcb5   : > { %4346 = vmatprep.subr.bf16.mxu1 %v4825_v59 }
 0xd82   : > { %v1538_v35 = vpop.f32.mrb[0].mxu1 }
 0xd83   : > { %v1539_v36 = vadd.f32 %v5413_v51, %v1538_v35  ;;  %v3924_v37 = vpop.f32.mrb[1].mxu1 }
 0xd85   : > { %v1542_v38 = vmax.f32 %v1539_v36, 0.0 }
 0xd87   : > { %3934 = vmatmul.mubr.msk.f32.vlgmr.msra.gmra.mrb[2].mxu1 %vm218_vm0, %v1542_v38 }
 0xd88   : > { %4348 = vmatpush3.bf16.msra.mxu1 %v5450_v27  ;;  %3959 = vmatprep.mubr.msk.f32.mxu1 %vm4826_vm3, %v4827_v60 }
 0xd89   : > { %4349 = vmatprep.subr.bf16.mxu1 %v4825_v59 }
 0xd8c   : > { %4351 = vmatpush3.bf16.msra.mxu1 %v5485_v45 }
 0xd8d   : > { %4358 = vmatprep.subr.bf16.mxu1 %v4825_v59 }
 0xe5a   : > { %v1612_v39 = vpop.f32.mrb[2].mxu1 }
 0xe5b   : > { %v5519_v40 = vadd.f32 %v5415_v52, %v1612_v39  ;;  %v3935_v41 = vpop.f32.mrb[3].mxu1 }
 0xe5d   : > { %v1617_v42 = vmul.f32 0.035714287, %v5519_v40 }
 0xe5f   : > { %v1618_v44 = vadd.f32 %v4808_v54, %v1617_v42 }
 0xe61   : > { %3949 = vmatmul.mubr.msk.f32.vlgmr.msra.gmra.mrb[2].mxu0 %vm1390_vm7, %v1618_v44 }
 0xe62   : > { %4354 = vmatpush3.bf16.msra.mxu0 %v5497_v28  ;;  %3970 = vmatprep.mubr.msk.f32.mxu0 %vm4826_vm3, %v4827_v60 }
 0xe63   : > { %4355 = vmatprep.subr.bf16.mxu0 %v4825_v59 }
 0xe66   : > { %4357 = vmatpush3.bf16.msra.mxu0 %v5506_v34 }
 0xe67   : > { %4368 = vmatprep.subr.bf16.mxu0 %v4825_v59 }
 0xf34   : > { %v1691_v49 = vpop.f32.mrb[2].mxu0 }
 0xf35   : > { %v1692_v23 = vadd.f32 %v1691_v49, %v1621_v48  ;;  %v3950_v2 = vpop.f32.mrb[3].mxu0 }
 0xf37   : > { %v1695_v55 = vmax.f32 %v1692_v23, 0.0 }
 0xf39   : > { %3960 = vmatmul.mubr.msk.f32.vlgmr.msra.gmra.mrb[4].mxu1 %vm218_vm0, %v1695_v55 }
 0xf3a   : > { %4360 = vmatpush3.bf16.msra.mxu1 %v5437_v26  ;;  %3985 = vmatprep.mubr.msk.f32.mxu1 %vm4826_vm3, %v4827_v60 }
 0xf3b   : > { %4361 = vmatprep.subr.bf16.mxu1 %v4825_v59 }
 0xf3e   : > { %4363 = vmatpush3.bf16.msra.mxu1 %v5444_v21 }
 0xf3f   : > { %4364 = vmatprep.subr.bf16.mxu1 %v4825_v59 }
 0xf42   : > { %4367 = vmatpush3.bf16.msk.msra.mxu1 %vm5463_vm6, %v5460_v61 }
 0xf43   : > { %4374 = vmatprep.subr.bf16.mxu1 %v4825_v59 }
0x100c   : > { %v1765_v57 = vpop.f32.mrb[4].mxu1 }
0x100d   : > { %v1766_v62 = vadd.f32 %v5413_v51, %v1765_v57  ;;  %v3961_v63 = vpop.f32.mrb[5].mxu1 }
0x100f   : > { %v1769_v29 = vmax.f32 %v1766_v62, 0.0 }
0x1011   : > { %3971 = vmatmul.mubr.msk.f32.vlgmr.msra.gmra.mrb[4].mxu0 %vm218_vm0, %v1769_v29 }
0x1012   : > { %4370 = vmatpush3.bf16.msra.mxu0 %v5450_v27  ;;  %3996 = vmatprep.mubr.msk.f32.mxu0 %vm4826_vm3, %v4827_v60 }
0x1013   : > { %4371 = vmatprep.subr.bf16.mxu0 %v4825_v59 }
0x1016   : > { %4373 = vmatpush3.bf16.msra.mxu0 %v5485_v45 }
0x1017   : > { %4380 = vmatprep.subr.bf16.mxu0 %v4825_v59 }
0x10e4   : > { %v1839_v30 = vpop.f32.mrb[4].mxu0 }
0x10e5   : > { %v1840_v31 = vadd.f32 %v5415_v52, %v1839_v30  ;;  %v3972_v32 = vpop.f32.mrb[5].mxu0 }
0x10e7   : > { %v1843_v33 = vmul.f32 0.035714287, %v1840_v31  ;;  %v2293_v47 = vmul.f32 2.0, %v1840_v31 }
0x10e9   : > { %v1844_v35 = vadd.f32 %v4808_v54, %v1843_v33  ;;  %v2294_v2 = vadd.f32 %v2293_v47, %v5519_v40  ;;  %v2069_v40 = vstv %s5591_s2 }
0x10ea   : > { %v2070_v29 = vmul.f32 %v5409_v25, %v2069_v40 }
0x10eb   : > { %3986 = vmatmul.mubr.msk.f32.vlgmr.msra.gmra.mrb[6].mxu1 %vm1390_vm7, %v1844_v35 }
0x10ec   : > { %4376 = vmatpush3.bf16.msra.mxu1 %v5497_v28  ;;  %4007 = vmatprep.mubr.msk.f32.mxu1 %vm4826_vm3, %v4827_v60  ;;  %v2071_v30 = vadd.f32 %v5411_v50, %v2070_v29 }
0x10ed   : > { %4377 = vmatprep.subr.bf16.mxu1 %v4825_v59 }
0x10f0   : > { %4379 = vmatpush3.bf16.msra.mxu1 %v5506_v34 }
0x10f1   : > { %4390 = vmatprep.subr.bf16.mxu1 %v4825_v59 }
0x11be   : > { %v1914_v36 = vpop.f32.mrb[6].mxu1 }
0x11bf   : > { %v1915_v37 = vadd.f32 %v1914_v36, %v1621_v48  ;;  %v3987_v38 = vpop.f32.mrb[7].mxu1 }
0x11c1   : > { %v1918_v39 = vmax.f32 %v1915_v37, 0.0 }
0x11c3   : > { %3997 = vmatmul.mubr.msk.f32.vlgmr.msra.gmra.mrb[6].mxu0 %vm218_vm0, %v1918_v39 }
0x11c4   : > { %4382 = vmatpush3.bf16.msra.mxu0 %v5437_v26  ;;  %4022 = vmatprep.mubr.msk.f32.mxu0 %vm4826_vm3, %v4827_v60 }
0x11c5   : > { %4383 = vmatprep.subr.bf16.mxu0 %v4825_v59 }
0x11c8   : > { %4385 = vmatpush3.bf16.msra.mxu0 %v5444_v21 }
0x11c9   : > { %4386 = vmatprep.subr.bf16.mxu0 %v4825_v59 }
0x11cc   : > { %4389 = vmatpush3.bf16.msk.msra.mxu0 %vm5463_vm6, %v5460_v61 }
0x11cd   : > { %4396 = vmatprep.subr.bf16.mxu0 %v4825_v59 }
0x1296   : > { %v1988_v41 = vpop.f32.mrb[6].mxu0 }
0x1297   : > { %v1989_v42 = vadd.f32 %v5413_v51, %v1988_v41  ;;  %v3998_v44 = vpop.f32.mrb[7].mxu0 }
0x1299   : > { %v1992_v46 = vmax.f32 %v1989_v42, 0.0 }
0x129b   : > { %4008 = vmatmul.mubr.msk.f32.vlgmr.msra.gmra.mrb[8].mxu1 %vm218_vm0, %v1992_v46 }
0x129c   : > { %4392 = vmatpush3.bf16.msra.mxu1 %v5450_v27  ;;  %4033 = vmatprep.mubr.msk.f32.mxu1 %vm4826_vm3, %v4827_v60 }
0x129d   : > { %4393 = vmatprep.subr.bf16.mxu1 %v4825_v59 }
0x12a0   : > { %4395 = vmatpush3.bf16.msra.mxu1 %v5485_v45 }
0x12a1   : > { %4402 = vmatprep.subr.bf16.mxu1 %v4825_v59 }
0x136e   : > { %v2062_v48 = vpop.f32.mrb[8].mxu1 }
0x136f   : > { %v2063_v49 = vadd.f32 %v5415_v52, %v2062_v48  ;;  %v4009_v23 = vpop.f32.mrb[9].mxu1 }
0x1371   : > { %v2067_v55 = vmul.f32 0.071428575, %v2063_v49  ;;  %v2295_v57 = vmul.f32 2.0, %v2063_v49 }
0x1373   : > { %v2068_v62 = vadd.f32 %v4808_v54, %v2067_v55  ;;  %v2296_v63 = vadd.f32 %v2295_v57, %v2294_v2 }
0x1375   : > { %4023 = vmatmul.mubr.msk.f32.vlgmr.msra.gmra.mrb[8].mxu0 %vm1390_vm7, %v2068_v62 }
0x1376   : > { %4398 = vmatpush3.bf16.msra.mxu0 %v5497_v28  ;;  %4044 = vmatprep.mubr.msk.f32.mxu0 %vm4826_vm3, %v4827_v60 }
0x1377   : > { %4399 = vmatprep.subr.bf16.mxu0 %v4825_v59 }
0x137a   : > { %4401 = vmatpush3.bf16.msra.mxu0 %v5506_v34 }
0x137b   : > { %4412 = vmatprep.subr.bf16.mxu0 %v4825_v59 }
0x1448   : > { %v2141_v31 = vpop.f32.mrb[8].mxu0 }
0x1449   : > { %v2142_v32 = vadd.f32 %v2141_v31, %v2071_v30  ;;  %v4024_v33 = vpop.f32.mrb[9].mxu0 }
0x144a   : > { %v2528_v33 = vstv %s2525_s26 }
0x144b   : > { %v2145_v35 = vmax.f32 %v2142_v32, 0.0 }
0x144d   : > { %4034 = vmatmul.mubr.msk.f32.vlgmr.msra.gmra.mrb[10].mxu1 %vm218_vm0, %v2145_v35  ;;  %v2529_v35 = vmul.f32 %v5409_v25, %v2528_v33 }
0x144e   : > { %4404 = vmatpush3.bf16.msra.mxu1 %v5437_v26  ;;  %4059 = vmatprep.mubr.msk.f32.mxu1 %vm4826_vm3, %v4827_v60 }
0x144f   : > { %4405 = vmatprep.subr.bf16.mxu1 %v4825_v59 }
0x1452   : > { %4407 = vmatpush3.bf16.msra.mxu1 %v5444_v21 }
0x1453   : > { %4408 = vmatprep.subr.bf16.mxu1 %v4825_v59 }
0x1456   : > { %4411 = vmatpush3.bf16.msk.msra.mxu1 %vm5463_vm6, %v5460_v61 }
0x1457   : > { %4418 = vmatprep.subr.bf16.mxu1 %v4825_v59 }
0x1520   : > { %v2215_v36 = vpop.f32.mrb[10].mxu1 }
0x1521   : > { %v2216_v37 = vadd.f32 %v5413_v51, %v2215_v36  ;;  %v4035_v38 = vpop.f32.mrb[11].mxu1  ;;  %v2530_v36 = vadd.f32 %v5411_v50, %v2529_v35 }
0x1523   : > { %v2219_v39 = vmax.f32 %v2216_v37, 0.0 }
0x1525   : > { %4045 = vmatmul.mubr.msk.f32.vlgmr.msra.gmra.mrb[10].mxu0 %vm218_vm0, %v2219_v39 }
0x1526   : > { %4414 = vmatpush3.bf16.msra.mxu0 %v5450_v27  ;;  %4070 = vmatprep.mubr.msk.f32.mxu0 %vm4826_vm3, %v4827_v60 }
0x1527   : > { %4415 = vmatprep.subr.bf16.mxu0 %v4825_v59 }
0x152a   : > { %4417 = vmatpush3.bf16.msra.mxu0 %v5485_v45 }
0x152b   : > { %4424 = vmatprep.subr.bf16.mxu0 %v4825_v59 }
0x15f8   : > { %v2289_v41 = vpop.f32.mrb[10].mxu0 }
0x15f9   : > { %v2290_v42 = vadd.f32 %v5415_v52, %v2289_v41  ;;  %v4046_v44 = vpop.f32.mrb[11].mxu0 }
0x15fb   : > { %v2297_v46 = vadd.f32 %v2296_v63, %v2290_v42 }
0x15fd   : > { %v2298_v47 = vmul.f32 0.011904762, %v2297_v46 }
0x15ff   : > { %v5617_v48 = vadd.f32 %v4808_v54, %v2298_v47 }
0x1601   : > { %4060 = vmatmul.mubr.msk.f32.vlgmr.msra.gmra.mrb[12].mxu1 %vm1390_vm7, %v5617_v48 }
0x1602   : > { %4420 = vmatpush3.bf16.msra.mxu1 %v5497_v28  ;;  %4081 = vmatprep.mubr.msk.f32.mxu1 %vm4826_vm3, %v4827_v60 }
0x1603   : > { %4421 = vmatprep.subr.bf16.mxu1 %v4825_v59 }
0x1606   : > { %4423 = vmatpush3.bf16.msra.mxu1 %v5506_v34 }
0x1607   : > { %4434 = vmatprep.subr.bf16.mxu1 %v4825_v59 }
0x16d4   : > { %v2373_v49 = vpop.f32.mrb[12].mxu1 }
0x16d5   : > { %v2374_v23 = vadd.f32 %v2373_v49, %v2071_v30  ;;  %v4061_v2 = vpop.f32.mrb[13].mxu1 }
0x16d7   : > { %v2377_v55 = vmax.f32 %v2374_v23, 0.0 }
0x16d9   : > { %4071 = vmatmul.mubr.msk.f32.vlgmr.msra.gmra.mrb[12].mxu0 %vm218_vm0, %v2377_v55 }
0x16da   : > { %4426 = vmatpush3.bf16.msra.mxu0 %v5437_v26  ;;  %4096 = vmatprep.mubr.msk.f32.mxu0 %vm4826_vm3, %v4827_v60 }
0x16db   : > { %4427 = vmatprep.subr.bf16.mxu0 %v4825_v59 }
0x16de   : > { %4429 = vmatpush3.bf16.msra.mxu0 %v5444_v21 }
0x16df   : > { %4430 = vmatprep.subr.bf16.mxu0 %v4825_v59 }
0x16e2   : > { %4433 = vmatpush3.bf16.msk.msra.mxu0 %vm5463_vm6, %v5460_v61 }
0x16e3   : > { %4440 = vmatprep.subr.bf16.mxu0 %v4825_v59 }
0x17ac   : > { %v2447_v54 = vpop.f32.mrb[12].mxu0 }
0x17ad   : > { %v2448_v57 = vadd.f32 %v5413_v51, %v2447_v54  ;;  %v4072_v62 = vpop.f32.mrb[13].mxu0 }
0x17af   : > { %v2451_v63 = vmax.f32 %v2448_v57, 0.0 }
0x17b1   : > { %4082 = vmatmul.mubr.msk.f32.vlgmr.msra.gmra.mrb[14].mxu1 %vm218_vm0, %v2451_v63 }
0x17b2   : > { %4436 = vmatpush3.bf16.msra.mxu1 %v5450_v27  ;;  %4107 = vmatprep.mubr.msk.f32.mxu1 %vm4826_vm3, %v4827_v60 }
0x17b3   : > { %4437 = vmatprep.subr.bf16.mxu1 %v4825_v59 }
0x17b6   : > { %4439 = vmatpush3.bf16.msra.mxu1 %v5485_v45 }
0x17b7   : > { %4446 = vmatprep.subr.bf16.mxu1 %v4825_v59 }
0x1884   : > { %v2521_v40 = vpop.f32.mrb[14].mxu1 }
0x1885   : > { %v5647_v29 = vadd.f32 %v5415_v52, %v2521_v40  ;;  %v4083_v30 = vpop.f32.mrb[15].mxu1 }
0x1887   : > { %v2526_v31 = vmul.f32 0.035714287, %v5647_v29 }
0x1889   : > { %v2527_v32 = vadd.f32 %v2526_v31, %v5617_v48 }
0x188b   : > { %4097 = vmatmul.mubr.msk.f32.vlgmr.msra.gmra.mrb[14].mxu0 %vm1390_vm7, %v2527_v32 }
0x188c   : > { %4442 = vmatpush3.bf16.msra.mxu0 %v5497_v28  ;;  %4118 = vmatprep.mubr.msk.f32.mxu0 %vm4826_vm3, %v4827_v60 }
0x188d   : > { %4443 = vmatprep.subr.bf16.mxu0 %v4825_v59 }
0x1890   : > { %4445 = vmatpush3.bf16.msra.mxu0 %v5506_v34 }
0x1891   : > { %4456 = vmatprep.subr.bf16.mxu0 %v4825_v59 }
0x195e   : > { %v2600_v37 = vpop.f32.mrb[14].mxu0 }
0x195f   : > { %v2601_v38 = vadd.f32 %v2600_v37, %v2530_v36  ;;  %v4098_v39 = vpop.f32.mrb[15].mxu0 }
0x1961   : > { %v2604_v41 = vmax.f32 %v2601_v38, 0.0 }
0x1963   : > { %4108 = vmatmul.mubr.msk.f32.vlgmr.msra.gmra.mrb[16].mxu1 %vm218_vm0, %v2604_v41 }
0x1964   : > { %4448 = vmatpush3.bf16.msra.mxu1 %v5437_v26  ;;  %4133 = vmatprep.mubr.msk.f32.mxu1 %vm4826_vm3, %v4827_v60 }
0x1965   : > { %4449 = vmatprep.subr.bf16.mxu1 %v4825_v59 }
0x1968   : > { %4451 = vmatpush3.bf16.msra.mxu1 %v5444_v21 }
0x1969   : > { %4452 = vmatprep.subr.bf16.mxu1 %v4825_v59 }
0x196c   : > { %4455 = vmatpush3.bf16.msk.msra.mxu1 %vm5463_vm6, %v5460_v61 }
0x196d   : > { %4462 = vmatprep.subr.bf16.mxu1 %v4825_v59 }
0x1a36   : > { %v2674_v42 = vpop.f32.mrb[16].mxu1 }
0x1a37   : > { %v2675_v44 = vadd.f32 %v5413_v51, %v2674_v42  ;;  %v4109_v46 = vpop.f32.mrb[17].mxu1 }
0x1a39   : > { %v2678_v47 = vmax.f32 %v2675_v44, 0.0 }
0x1a3b   : > { %4119 = vmatmul.mubr.msk.f32.vlgmr.msra.gmra.mrb[16].mxu0 %vm218_vm0, %v2678_v47 }
0x1a3c   : > { %4458 = vmatpush3.bf16.msra.mxu0 %v5450_v27  ;;  %4144 = vmatprep.mubr.msk.f32.mxu0 %vm4826_vm3, %v4827_v60 }
0x1a3d   : > { %4459 = vmatprep.subr.bf16.mxu0 %v4825_v59 }
0x1a40   : > { %4461 = vmatpush3.bf16.msra.mxu0 %v5485_v45 }
0x1a41   : > { %4468 = vmatprep.subr.bf16.mxu0 %v4825_v59 }
0x1b0e   : > { %v2748_v49 = vpop.f32.mrb[16].mxu0 }
0x1b0f   : > { %v2749_v23 = vadd.f32 %v5415_v52, %v2748_v49  ;;  %v4120_v2 = vpop.f32.mrb[17].mxu0 }
0x1b11   : > { %v2752_v55 = vmul.f32 0.035714287, %v2749_v23 }
0x1b13   : > { %v2753_v54 = vadd.f32 %v2752_v55, %v5617_v48 }
0x1b15   : > { %4134 = vmatmul.mubr.msk.f32.vlgmr.msra.gmra.mrb[18].mxu1 %vm1390_vm7, %v2753_v54 }
0x1b16   : > { %4464 = vmatpush3.bf16.msra.mxu1 %v5497_v28  ;;  %4155 = vmatprep.mubr.msk.f32.mxu1 %vm4826_vm3, %v4827_v60 }
0x1b17   : > { %4465 = vmatprep.subr.bf16.mxu1 %v4825_v59 }
0x1b1a   : > { %4467 = vmatpush3.bf16.msra.mxu1 %v5506_v34 }
0x1b1b   : > { %4478 = vmatprep.subr.bf16.mxu1 %v4825_v59 }
0x1be8   : > { %v2823_v57 = vpop.f32.mrb[18].mxu1 }
0x1be9   : > { %v2824_v62 = vadd.f32 %v2823_v57, %v2530_v36  ;;  %v4135_v63 = vpop.f32.mrb[19].mxu1  ;;  %v4490_v57 = vpack.c.bf16 (%p1378_p9), %v5387_v18, %v5382_v17 }
0x1beb   : > { %v2827_v40 = vmax.f32 %v2824_v62, 0.0  ;;  %v4494_v62 = vpack.c.bf16 (%p1378_p9), %v5397_v20, %v5392_v19 }
0x1bed   : > { %4145 = vmatmul.mubr.msk.f32.vlgmr.msra.gmra.mrb[18].mxu0 %vm218_vm0, %v2827_v40 }
0x1bee   : > { %4470 = vmatpush3.bf16.msra.mxu0 %v5437_v26  ;;  %4170 = vmatprep.mubr.msk.f32.mxu0 %vm4826_vm3, %v4827_v60 }
0x1bef   : > { %4471 = vmatprep.subr.bf16.mxu0 %v4825_v59 }
0x1bf2   : > { %4473 = vmatpush3.bf16.msra.mxu0 %v5444_v21  ;;  %v3202_v21 = vmul.f32 2.0, %v2749_v23 }
0x1bf3   : > { %4474 = vmatprep.subr.bf16.mxu0 %v4825_v59 }
0x1bf4   : > { %v3203_v36 = vadd.f32 %v3202_v21, %v5647_v29 }
0x1bf6   : > { %4477 = vmatpush3.bf16.msk.msra.mxu0 %vm5463_vm6, %v5460_v61 }
0x1bf7   : > { %4484 = vmatprep.subr.bf16.mxu0 %v4825_v59 }
0x1cc0   : > { %v2897_v30 = vpop.f32.mrb[18].mxu0 }
0x1cc1   : > { %v2898_v31 = vadd.f32 %v5413_v51, %v2897_v30  ;;  %v4146_v32 = vpop.f32.mrb[19].mxu0 }
0x1cc3   : > { %v2901_v26 = vmax.f32 %v2898_v31, 0.0 }
0x1cc5   : > { %4156 = vmatmul.mubr.msk.f32.vlgmr.msra.gmra.mrb[20].mxu1 %vm218_vm0, %v2901_v26  ;;  %v4498_v26 = vpack.c.bf16 (%p1378_p9), %v5407_v24, %v5402_v22 }
0x1cc6   : > { %4480 = vmatpush3.bf16.msra.mxu1 %v5450_v27  ;;  %4181 = vmatprep.mubr.msk.f32.mxu1 %vm4826_vm3, %v4827_v60 }
0x1cc7   : > { %4481 = vmatprep.subr.bf16.mxu1 %v4825_v59 }
0x1cca   : > { %4483 = vmatpush3.bf16.msra.mxu1 %v5485_v45  ;;  %v2978_v45 = vstv %s2975_s6 }
0x1ccb   : > { %v2979_v29 = vmul.f32 %v5409_v25, %v2978_v45 }
0x1ccd   : > { %v2980_v41 = vadd.f32 %v5411_v50, %v2979_v29 }
0x1d98   : > { %v2971_v61 = vpop.f32.mrb[20].mxu1 }
0x1d99   : > { %v2972_v33 = vadd.f32 %v5415_v52, %v2971_v61  ;;  %v4157_v35 = vpop.f32.mrb[21].mxu1 }
0x1d9b   : > { %v2976_v37 = vmul.f32 0.071428575, %v2972_v33  ;;  %v3204_v38 = vmul.f32 2.0, %v2972_v33 }
0x1d9d   : > { %v2977_v39 = vadd.f32 %v2976_v37, %v5617_v48  ;;  %v3205_v27 = vadd.f32 %v3204_v38, %v3203_v36 }
0x1d9f   : > { %4171 = vmatmul.mubr.msk.f32.vlgmr.msra.gmra.mrb[20].mxu0 %vm1390_vm7, %v2977_v39 }
0x1da0   : > { %4486 = vmatpush3.bf16.msra.mxu0 %v5497_v28  ;;  %4192 = vmatprep.mubr.msk.f32.mxu0 %vm4826_vm3, %v4827_v60 }
0x1da1   : > { %4487 = vmatprep.subr.bf16.mxu0 %v4825_v59 }
0x1da4   : > { %4489 = vmatpush3.bf16.msra.mxu0 %v5506_v34 }
0x1da5   :  { %4491 = vmatprep.subr.bf16.mxu0 (%p1378_p9), %v4490_v57 }
0x1e72   : > { %v3050_v42 = vpop.f32.mrb[20].mxu0 }
0x1e73   : > { %v3051_v44 = vadd.f32 %v3050_v42, %v2980_v41  ;;  %v4172_v46 = vpop.f32.mrb[21].mxu0 }
0x1e75   : > { %v3054_v47 = vmax.f32 %v3051_v44, 0.0 }
0x1e77   : > { %4182 = vmatmul.mubr.msk.f32.vlgmr.msra.gmra.mrb[22].mxu1 %vm218_vm0, %v3054_v47 }
0x1f4a   : > { %v3124_v28 = vpop.f32.mrb[22].mxu1 }
0x1f4b   : > { %v3125_v60 = vadd.f32 %v5413_v51, %v3124_v28  ;;  %v4183_v49 = vpop.f32.mrb[23].mxu1 }
0x1f4d   : > { %v3128_v59 = vmax.f32 %v3125_v60, 0.0 }
0x1f4f   : > { %4193 = vmatmul.mubr.msk.f32.vlgmr.msra.gmra.mrb[22].mxu0 %vm218_vm0, %v3128_v59 }
0x1f50   :  { %4493 = vmatpush3.bf16.msra.mxu0 (%p1378_p9), %v4490_v57 }
0x1f51   :  { %4495 = vmatprep.subr.bf16.mxu0 (%p1378_p9), %v4494_v62 }
0x1f54   :  { %4497 = vmatpush3.bf16.msra.mxu0 (%p1378_p9), %v4494_v62 }
0x1f55   :  { %4500 = vmatprep.subr.msk.bf16.mxu0 (%p1378_p9), %vm5463_vm6, %v4498_v26 }
0x1f58   :  { %4503 = vmatpush3.bf16.msk.msra.mxu0 (%p1378_p9), %vm5463_vm6, %v4498_v26 }
0x2022   : > { %v3198_v34 = vpop.f32.mrb[22].mxu0 }
0x2023   : > { %v3199_v23 = vadd.f32 %v5415_v52, %v3198_v34  ;;  %v4194_v2 = vpop.f32.mrb[23].mxu0 }
0x2025   : > { %v3206_v55 = vadd.f32 %v3205_v27, %v3199_v23  ;;  %1380 = sbr.rel (!%p1378_p9) target bundleno = 3018 (0xbca), region = 162 }
0x2027   : > { %v3207_v54 = vmul.f32 0.011904762, %v3206_v55 }
0x2029   : > { %v3208_v54 = vadd.f32 %v3207_v54, %v5617_v48  }
0x202b   : > { %3211 = vst.msk [vmem:[%s3210_s18] sm:$0x3] %vm1370_vm1, %v3208_v54 }
0x2032   :  { %v3212_v63 = vld [vmem:[#allocation2] sm:$0x1]  ;;  %v3213_v40 = vld [vmem:[#allocation2 + $0x2] sm:$0x1]  ;;  %v3214_v48 = vld [vmem:[#allocation2 + $0x4] sm:$0x1] }
0x2033   :  { %v3215_v30 = vld [vmem:[#allocation2 + $0x6] sm:$0x1]  ;;  %v3216_v31 = vld [vmem:[#allocation2 + $0x8] sm:$0x1]  ;;  %v3217_v32 = vld [vmem:[#allocation2 + $0xa] sm:$0x1] }
0x2034   :  { %v3218_v21 = vld [vmem:[#allocation2 + $0xc] sm:$0x1]  ;;  %v3236_v61 = vrot.slane %v3213_v40, 7  ;;  %v3219_v3 = vld [vmem:[#allocation2 + $0xe] sm:$0x1]  ;;  %v3239_v4 = vrot.slane %v3214_v48, 6 }
0x2035   :  { %v3242_v5 = vrot.slane %v3215_v30, 5  ;;  %v3245_v7 = vrot.slane %v3216_v31, 4  ;;  %v3248_v8 = vrot.slane %v3217_v32, 3  ;;  %v3251_v10 = vrot.slane %v3218_v21, 2  ;;  %v3221_v11 = vld [vmem:[#allocation2 + $0x3] sm:$0x1] }
0x2036   :  { %v3238_v6 = vsel %vm3237_vm8, %v3236_v61, %v3212_v63  ;;  %v3222_v12 = vld [vmem:[#allocation2 + $0x5] sm:$0x1]  ;;  %v3254_v14 = vrot.slane %v3219_v3, 1  ;;  %v3223_v15 = vld [vmem:[#allocation2 + $0x7] sm:$0x1]  ;;  %v3265_v24 = vrot.slane %v3221_v11, 7 }
0x2037   :  { %v3241_v9 = vsel %vm3240_vm9, %v3239_v4, %v3238_v6  ;;  %v3224_v16 = vld [vmem:[#allocation2 + $0x9] sm:$0x1]  ;;  %v3220_v18 = vld [vmem:[#allocation2 + $0x1] sm:$0x1]  ;;  %v3225_v19 = vld [vmem:[#allocation2 + $0xb] sm:$0x1] }
0x2038   :  { %v3244_v13 = vsel %vm3243_vm10, %v3242_v5, %v3241_v9  ;;  %v3226_v22 = vld [vmem:[#allocation2 + $0xd] sm:$0x1]  ;;  %v3267_v25 = vrot.slane %v3222_v12, 6  ;;  %v3269_v50 = vrot.slane %v3223_v15, 5  ;;  %v3227_v52 = vld [vmem:[#allocation2 + $0xf] sm:$0x1]  ;;  %v3266_v36 = vsel %vm3237_vm8, %v3265_v24, %v3220_v18 }
0x2039   :  { %v3247_v17 = vsel %vm3246_vm11, %v3245_v7, %v3244_v13  ;;  %v3271_v33 = vrot.slane %v3224_v16, 4  ;;  %v3273_v37 = vrot.slane %v3225_v19, 3  ;;  %v3275_v39 = vrot.slane %v3226_v22, 2  ;;  %v3532_v5 = vld [vmem:[#allocation14] ss:$0 sm:$0xff] }
0x203a   :  { %v3250_v20 = vsel %vm3249_vm12, %v3248_v8, %v3247_v17  ;;  %v3268_v38 = vsel %vm3240_vm9, %v3267_v25, %v3266_v36  ;;  %v3277_v45 = vrot.slane %v3227_v52, 1  ;;  %v3533_v7 = vld [vmem:[#allocation15] ss:$0 sm:$0xff] }
0x203b   :  { %v3253_v51 = vsel %vm3252_vm13, %v3251_v10, %v3250_v20  ;;  %v3270_v27 = vsel %vm3243_vm10, %v3269_v50, %v3268_v38 }
0x203c   :  { %v3256_v35 = vsel %vm3255_vm14, %v3254_v14, %v3253_v51  ;;  %v3272_v29 = vsel %vm3246_vm11, %v3271_v33, %v3270_v27 }
0x203d   :  { %4207 = vmatprep.mubr.msk.f32.mxu0 %vm1390_vm7, %v3256_v35  ;;  %v3274_v41 = vsel %vm3249_vm12, %v3273_v37, %v3272_v29 }
0x203e   :  { %v3276_v42 = vsel %vm3252_vm13, %v3275_v39, %v3274_v41 }
0x203f   :  { %v3278_v44 = vsel %vm3255_vm14, %v3277_v45, %v3276_v42 }
0x2040   :  { %4208 = vmatmul.mubr.msk.f32.vlgmr.msra.gmra.mrb[0].mxu0 %vm1390_vm7, %v3278_v44 }
0x2113   :  { %v4209_v43 = vpop.f32.mrb[0].mxu0 }
0x2114   :  { %v3360_v46 = vadd.f32 %v4209_v43, %v5417_v53  ;;  %v3354_v47 = vpop.f32.mrb[1].mxu0 }
0x2115   :  { %v3355_v28 = vadd.f32 %v5417_v53, %v3354_v47 }
0x2116   :  { %v3364_v60 = vadd.f32 %v3360_v46, %v5047_v1 }
0x2117   :  { %v3363_v49 = vadd.f32 %v3355_v28, %v5042_v0 }
0x2118   :  { %v3366_v59 = vadd.f32 %v3364_v60, %v5420_v56 }
0x2119   :  { %v3365_v34 = vadd.f32 %v3363_v49, %v5423_v58 }
0x211a   :  { %v3377_v54 = vmul.f32 %v3366_v59, %v3366_v59  ;;  %v3370_v57 = vsel %vm218_vm0, %v3366_v59, 0.0 }
0x211b   :  { %v3367_v23 = vsel %vm218_vm0, %v3365_v34, 0.0  ;;  %v3376_v2 = vmul.f32 %v3365_v34, %v3365_v34 }
0x211c   :  { %3368 = vadd.xlane.f32.xlu0 %v3367_v23  ;;  %v3381_v53 = vsel %vm218_vm0, %v3377_v54, 0.0 }
0x211d   :  { %v3378_v55 = vsel %vm218_vm0, %v3376_v2, 0.0 }
0x211e   :  { %3379 = vadd.xlane.f32.xlu1 %v3378_v55 }
0x2120   :  { %3371 = vadd.xlane.f32.xlu0 %v3370_v57 }
0x2122   :  { %3382 = vadd.xlane.f32.xlu1 %v3381_v53 }
0x21a9   :  { %v3369_v1 = vpop.xlane.xlu0 %3368 }
0x21aa   :  { %v3374_v0 = vmul.f32 0.03125, %v3369_v1 }
0x21ab   :  { %v3380_v62 = vpop.xlane.xlu1 %3379 }
0x21ac   :  { %v3386_v56 = vmul.f32 %v3374_v0, %v3374_v0  ;;  %v3384_v63 = vmul.f32 0.03125, %v3380_v62  ;;  %v3390_v3 = vsub.f32 %v3365_v34, %v3374_v0 }
0x21ad   :  { %v3372_v58 = vpop.xlane.xlu0 %3371 }
0x21ae   :  { %v3388_v40 = vsub.f32 %v3384_v63, %v3386_v56  ;;  %v3375_v48 = vmul.f32 0.03125, %v3372_v58 }
0x21af   :  { %v3383_v30 = vpop.xlane.xlu1 %3382 }
0x21b0   :  { %v3392_v31 = vadd.f32 1e-12, %v3388_v40  ;;  %v3387_v32 = vmul.f32 %v3375_v48, %v3375_v48  ;;  %v3385_v26 = vmul.f32 0.03125, %v3383_v30  ;;  %v3391_v8 = vsub.f32 %v3366_v59, %v3375_v48 }
0x21b2   :  { %4560 = vrsqrt.f32 %v3392_v31  ;;  %v3389_v21 = vsub.f32 %v3385_v26, %v3387_v32 }
0x21b4   :  { %v3393_v61 = vadd.f32 1e-12, %v3389_v21 }
0x21b6   :  { %4562 = vrsqrt.f32 %v3393_v61 }
0x21bc   :  { %v4561_v4 = vpop.eup %4560 }
0x21bd   :  { %v3396_v6 = vmul.f32 %v4561_v4, %v3390_v3 }
0x21bf   :  { %v3412_v9 = vmul.f32 %v3532_v5, %v3396_v6 }
0x21c0   :  { %v4563_v10 = vpop.eup %4562 }
0x21c1   :  { %v3397_v11 = vmul.f32 %v4563_v10, %v3391_v8  ;;  %v3414_v12 = vadd.f32 %v3533_v7, %v3412_v9 }
0x21c3   :  { %v3413_v13 = vmul.f32 %v3532_v5, %v3397_v11  ;;  %3416 = vst.msk [vmem:[#allocation17] sm:$0xff] %vm218_vm0, %v3414_v12 }
0x21c5   :  { %v3415_v14 = vadd.f32 %v3533_v7, %v3413_v13 }
0x21c7   :  { %3417 = vst.msk [vmem:[#allocation17 + $0x8] sm:$0xff] %vm218_vm0, %v3415_v14 }
0x21c8   :  { %4751 = shalt.err (!%p4748_p0)
}
0x21c9   :  { %s4752_s14 = scalar_lea.hbm %s5805_s21, 256 }
0x21ca   :  { %p4753_p1 = scmp.ne.s32.totalorder %s5805_s21, %s4752_s14  ;;  %p4756_p2 = scmp.lt.u32.totalorder %s4752_s14, %s5805_s21 }
0x21cc   :  { %p4758_p3 = pnand %p4756_p2, %p4753_p1 }
0x21ce   :  { %4761 = shalt.err (!%p4758_p3)
}
0x21cf   :  { %3429 = dma.vmem_to_hbm [thread:$0]  %s3424_s29, 256, %s5805_s21, [#allocation5], %s4819_s10, %s4819_s10, %s4820_s24  }
0x21d0   :  { %4792 = dma.done.wait [#allocation5], 256  }
0x21d1   :  { %4793 = vsyncadd [#allocation5], 4294967040 }
0x21d2   :  { %3433 = vsyncpa [#allocation4], 1 }
0x21d3   :  { %3434 = vsyncpa [#allocation7], 1 }
0x21d4   :  { %3435 = vsyncpa [#allocation10], 1 }
0x21d5   :  { %3436 = vsyncpa [#allocation13], 1 }
0x21d6   :  { %3437 = vsyncpa [#allocation16], 1 }
0x21d7   :  { %3438 = vsyncpa [#allocation5], 1 }

</bundles_post_ra>
